<compile_context>
chip_gen: v5e
topology: v5e:2x2
jax: 0.10.0
libtpu: 0.0.40
codegen_flags: <defaults>
</compile_context>

<pallas_src>
import functools

import jax
import jax.numpy as jnp
from jax.experimental import pallas as pl
from jax.experimental.pallas import tpu as pltpu

_K = 5  # conv kernel size


# ----------------------------------------------------------------------------
# Fused forward kernel (runs once per batch tile)
# ----------------------------------------------------------------------------
def _cnn_fused_kernel(x_ref,
                      t1_ref, c1b_ref,
                      c2w_ref, c2b_ref,
                      c3w_ref, c3b_ref,
                      c4w_ref, c4b_ref,
                      d1w_ref, d1b_ref,
                      d2w_ref, d2b_ref,
                      d3w_ref, d3b_ref,
                      o_ref,
                      xpad_ref, flat_ref,
                      *, K, L):
    TB = x_ref.shape[0]
    pad = (K - 1) // 2
    CP = flat_ref.shape[1] // L          # padded conv4 out channels (128)
    C1 = t1_ref.shape[1] // L            # conv1 out channels (16)
    cdt = t1_ref.dtype                   # MXU operand dtype (f32 or bf16)

    # Zero only the "same"-padding rows of the padded-activation scratch (constant
    # work).  Interior rows [pad, pad+L) are fully overwritten (up to :cin) by every
    # conv layer, and channels >= cin are never read.
    cmax = xpad_ref.shape[2]
    xpad_ref[:, :pad, :] = jnp.zeros((TB, pad, cmax), jnp.float32)
    xpad_ref[:, pad + L:, :] = jnp.zeros((TB, pad, cmax), jnp.float32)

    # ---- conv1 (Cin=1): one dense banded matmul; zero padding folded into T1.
    #      x (TB, L) @ T1 (L, L*16) -> channel-last flat (TB, L*16).
    h = jnp.dot(x_ref[...].astype(cdt), t1_ref[...],
                preferred_element_type=jnp.float32) + c1b_ref[...]
    h = jnp.maximum(h, 0.0)
    h = h.reshape(TB, L, C1)

    # ---- conv2..conv4: per-tap accumulation (no im2col scratch / reload).
    def conv_taps(h, w_ref, b_ref, relu):
        # h: (TB, L, Cin) channel-last.  w_ref: (K, Cin, Cout).  b_ref: (1, Cout).
        cin = w_ref.shape[1]
        cout = w_ref.shape[2]
        xpad_ref[:, pad:pad + L, :cin] = h
        acc = jnp.zeros((TB * L, cout), jnp.float32)
        for k in range(K):               # static unroll over the K taps
            xk = xpad_ref[:, k:k + L, :cin].reshape(TB * L, cin)
            acc = acc + jnp.dot(xk.astype(cdt), w_ref[k],
                                preferred_element_type=jnp.float32)
        acc = acc + b_ref[...]
        if relu:
            acc = jnp.maximum(acc, 0.0)
        return acc.reshape(TB, L, cout)

    h = conv_taps(h, c2w_ref, c2b_ref, True)
    h = conv_taps(h, c3w_ref, c3b_ref, True)
    h = conv_taps(h, c4w_ref, c4b_ref, False)        # (TB, L, 128), chans 100..127 == 0

    # TODO(synk): nn.Dropout(p=0.9) layers run as identity (eval-mode semantics).

    # ---- flatten (TB, L, 128) -> (TB, L*128): every store is 128-lane aligned.
    #      PyTorch's channel-major flatten order and the 100->128 channel padding are
    #      folded into d1_w's rows (prepare_params).
    for l in range(L):                   # static unroll
        flat_ref[:, l * CP:(l + 1) * CP] = h[:, l, :]

    # ---- decoder MLP.
    y = jnp.dot(flat_ref[...].astype(cdt), d1w_ref[...],
                preferred_element_type=jnp.float32) + d1b_ref[...]
    y = jnp.dot(y.astype(cdt), d2w_ref[...],
                preferred_element_type=jnp.float32) + d2b_ref[...]
    y = jnp.dot(y.astype(cdt), d3w_ref[...],
                preferred_element_type=jnp.float32) + d3b_ref[...]
    o_ref[...] = y.astype(o_ref.dtype)


# ----------------------------------------------------------------------------
# Wrapper
# ----------------------------------------------------------------------------
def cnn_forward(x, prep, *, batch_tile=None):
    """x: (B, L) with L == input_channels.  prep: output of prepare_params()."""
    B, L = x.shape
    K = _K
    num_classes = prep["d3_w"].shape[1]
    cin_max = prep["c4_w"].shape[1]      # widest conv input (64)
    CP = prep["c4_w"].shape[2]           # padded conv4 output channels (128)

    # Batch tile: ~7 KB/sample of scratch + ~0.65 MB resident weights, so TB=256
    # stays far below v5e's 16 MiB scoped VMEM and v7x's 64 MiB physical VMEM while
    # giving TB*L = 2048 GEMM rows (multiple of 128 and 256 for the MXU).
    if batch_tile is None:
        batch_tile = B if B <= 256 else 256
    TB = batch_tile
    nb = pl.cdiv(B, TB)
    Bp = nb * TB
    if Bp != B:
        x = jnp.pad(x, ((0, Bp - B), (0, 0)))

    weights = (
        prep["c1_t"], prep["c1_b"],
        prep["c2_w"], prep["c2_b"],
        prep["c3_w"], prep["c3_b"],
        prep["c4_w"], prep["c4_b"],
        prep["d1_w"], prep["d1_b"],
        prep["d2_w"], prep["d2_b"],
        prep["d3_w"], prep["d3_b"],
    )

    def const_spec(a):
        n = a.ndim
        return pl.BlockSpec(a.shape, lambda i, n=n: (0,) * n)  # VMEM-resident

    # Advisory cost estimate so XLA can schedule/overlap this small custom call.
    flops = 2 * L * prep["c1_t"].shape[1]
    for i in (2, 3, 4):
        k_, ci_, co_ = prep[f"c{i}_w"].shape
        flops += 2 * L * k_ * ci_ * co_
    for name in ("d1_w", "d2_w", "d3_w"):
        flops += 2 * prep[name].shape[0] * prep[name].shape[1]
    w_bytes = sum(int(w.size) * jnp.dtype(w.dtype).itemsize for w in weights)
    bytes_accessed = (int(x.size) * jnp.dtype(x.dtype).itemsize
                      + Bp * num_classes * jnp.dtype(x.dtype).itemsize + w_bytes)
    cost = pl.CostEstimate(flops=int(Bp * flops), transcendentals=0,
                           bytes_accessed=int(bytes_accessed))

    out = pl.pallas_call(
        functools.partial(_cnn_fused_kernel, K=K, L=L),
        out_shape=jax.ShapeDtypeStruct((Bp, num_classes), x.dtype),
        grid=(nb,),
        in_specs=[pl.BlockSpec((TB, L), lambda i: (i, 0))]
                 + [const_spec(w) for w in weights],
        out_specs=pl.BlockSpec((TB, num_classes), lambda i: (i, 0)),
        scratch_shapes=[
            pltpu.VMEM((TB, L + K - 1, cin_max), jnp.float32),  # padded activations
            pltpu.VMEM((TB, L * CP), jnp.float32),              # lane-aligned flatten
        ],
        compiler_params=pltpu.CompilerParams(
            dimension_semantics=("parallel",)),
        cost_estimate=cost,
    )(x, *weights)
    return out[:B]


# ----------------------------------------------------------------------------
# One-time parameter layout preparation (PyTorch layouts -> kernel layouts)
# ----------------------------------------------------------------------------
def prepare_params(params, input_channels, *, compute_dtype=jnp.float32):
    """compute_dtype=jnp.bfloat16 halves weight DMA / VMEM if lower precision is OK."""
    L = input_channels
    K = _K
    pad = (K - 1) // 2

    prep = {}
    # conv1 (Cin=1) -> dense banded matrix T1 (L, L*16); "same" zero padding is
    # folded in by dropping out-of-range rows.  Bias tiled to (1, L*16).
    w1 = params["c1_w"]                                    # (16, 1, K)
    c1 = w1.shape[0]
    T1 = jnp.zeros((L, L * c1), jnp.float32)
    for l in range(L):
        for k in range(K):
            j = l + k - pad                                # input position for (l, k)
            if 0 <= j < L:
                T1 = T1.at[j, l * c1:(l + 1) * c1].set(w1[:, 0, k])
    prep["c1_t"] = T1.astype(compute_dtype)
    prep["c1_b"] = jnp.tile(params["c1_b"], (L,)).reshape(1, L * c1).astype(jnp.float32)

    # conv2..conv4 -> per-tap weights (K, Cin, Cout); conv4 Cout zero-padded 100->128.
    CP = 128
    for i, cout_pad in ((2, None), (3, None), (4, CP)):
        w = params[f"c{i}_w"]                              # (Cout, Cin, K)
        b = params[f"c{i}_b"]
        cout = w.shape[0]
        wk = jnp.transpose(w, (2, 1, 0))                   # (K, Cin, Cout)
        if cout_pad is not None and cout_pad > cout:
            wk = jnp.pad(wk, ((0, 0), (0, 0), (0, cout_pad - cout)))
            b = jnp.pad(b, (0, cout_pad - cout))
        prep[f"c{i}_w"] = wk.astype(compute_dtype)
        prep[f"c{i}_b"] = b.reshape(1, -1).astype(jnp.float32)

    # Decoder 1: fold the channel-major flatten (index c*L + l) and the 100->128
    # channel padding into a row permutation / padding of the weight, so the kernel
    # consumes the lane-aligned channel-last flatten (index l*128 + c).
    w1d = params["d1_w"]                                   # (100, 100*L)
    dout1, din1 = w1d.shape
    c = din1 // L                                          # 100
    wt = jnp.transpose(w1d.reshape(dout1, c, L), (2, 1, 0))   # (L, 100, dout1)
    wt = jnp.pad(wt, ((0, 0), (0, CP - c), (0, 0)))            # (L, 128, dout1)
    prep["d1_w"] = wt.reshape(L * CP, dout1).astype(compute_dtype)
    prep["d1_b"] = params["d1_b"].reshape(1, -1).astype(jnp.float32)
    prep["d2_w"] = jnp.transpose(params["d2_w"]).astype(compute_dtype)
    prep["d2_b"] = params["d2_b"].reshape(1, -1).astype(jnp.float32)
    prep["d3_w"] = jnp.transpose(params["d3_w"]).astype(compute_dtype)
    prep["d3_b"] = params["d3_b"].reshape(1, -1).astype(jnp.float32)
    return prep


# ----------------------------------------------------------------------------
# Init (PyTorch default-style uniform init, PyTorch layouts)
# ----------------------------------------------------------------------------
def init_params(key, input_channels, num_classes):
    ks = jax.random.split(key, 14)

    def u(k, shape, fan_in):
        bound = 1.0 / jnp.sqrt(jnp.float32(fan_in))
        return jax.random.uniform(k, shape, jnp.float32, -bound, bound)

    conv_chans = [(1, 16), (16, 32), (32, 64), (64, 100)]
    params = {}
    for i, (cin, cout) in enumerate(conv_chans, start=1):
        params[f"c{i}_w"] = u(ks[2 * i - 2], (cout, cin, _K), cin * _K)
        params[f"c{i}_b"] = u(ks[2 * i - 1], (cout,), cin * _K)

    d_dims = [(100 * input_channels, 100), (100, 64), (64, num_classes)]
    for i, (din, dout) in enumerate(d_dims, start=1):
        params[f"d{i}_w"] = u(ks[8 + 2 * i - 2], (dout, din), din)
        params[f"d{i}_b"] = u(ks[8 + 2 * i - 1], (dout,), din)
    return params


# ----------------------------------------------------------------------------
# Plain-XLA reference (direct NCL port of the PyTorch module, eval mode)
# ----------------------------------------------------------------------------
def reference_forward(x, params):
    h = x[:, None, :]                                        # (B, 1, L)
    for name, relu in (("c1", True), ("c2", True), ("c3", True), ("c4", False)):
        w, b = params[f"{name}_w"], params[f"{name}_b"]      # (Cout, Cin, K), (Cout,)
        K = w.shape[2]
        pad = (K - 1) // 2
        hp = jnp.pad(h, ((0, 0), (0, 0), (pad, pad)))
        L = h.shape[2]
        cols = jnp.stack([hp[:, :, t:t + K] for t in range(L)], axis=2)  # (B,Cin,L,K)
        h = jnp.einsum("bclk,ock->bol", cols, w) + b[None, :, None]
        if relu:
            h = jnp.maximum(h, 0.0)
    h = h.reshape(h.shape[0], -1)                            # (B, 100*L) channel-major
    for name in ("d1", "d2", "d3"):
        w, b = params[f"{name}_w"], params[f"{name}_b"]
        h = h @ w.T + b
    return h


if __name__ == "__main__":
    input_channels = 8      # sequence length L; decoder first Linear is 100*L -> 100
    num_classes = 1
    B = 2

    key = jax.random.PRNGKey(0)
    k_params, k_x = jax.random.split(key)
    params = init_params(k_params, input_channels, num_classes)
    prep = prepare_params(params, input_channels)    # one-time layout prep
    x = jax.random.normal(k_x, (B, input_channels), jnp.float32)

    out = jax.block_until_ready(jax.jit(cnn_forward)(x, prep))
    assert out.shape == (B, num_classes), out.shape
    assert out.dtype == jnp.float32

    ref = reference_forward(x, params)
    assert jnp.allclose(out, ref, rtol=1e-3, atol=1e-3), (out, ref)

    print("KERNEL_OK")
</pallas_src>

<mosaic_0001>
module attributes {stable_mosaic.version = 11 : i64} {
  func.func @_cnn_fused_kernel(%arg0: i32, %arg1: memref<2x8xf32, #tpu.memory_space<vmem>>, %arg2: memref<8x128xf32, #tpu.memory_space<vmem>>, %arg3: memref<1x128xf32, #tpu.memory_space<vmem>>, %arg4: memref<5x16x32xf32, #tpu.memory_space<vmem>>, %arg5: memref<1x32xf32, #tpu.memory_space<vmem>>, %arg6: memref<5x32x64xf32, #tpu.memory_space<vmem>>, %arg7: memref<1x64xf32, #tpu.memory_space<vmem>>, %arg8: memref<5x64x128xf32, #tpu.memory_space<vmem>>, %arg9: memref<1x128xf32, #tpu.memory_space<vmem>>, %arg10: memref<1024x100xf32, #tpu.memory_space<vmem>>, %arg11: memref<1x100xf32, #tpu.memory_space<vmem>>, %arg12: memref<100x64xf32, #tpu.memory_space<vmem>>, %arg13: memref<1x64xf32, #tpu.memory_space<vmem>>, %arg14: memref<64x1xf32, #tpu.memory_space<vmem>>, %arg15: memref<1x1xf32, #tpu.memory_space<vmem>>, %arg16: memref<2x1xf32, #tpu.memory_space<vmem>>, %arg17: memref<2x12x64xf32, #tpu.memory_space<vmem>>, %arg18: memref<2x1024xf32, #tpu.memory_space<vmem>>) attributes {dimension_semantics = [#tpu.dimension_semantics<parallel>], iteration_bounds = array<i64: 1>, scalar_prefetch = 0 : i64, scratch_operands = 2 : i64, tpu.core_type = #tpu.core_type<tc>, window_params = [{transform_indices = @transform_0, window_bounds = array<i64: 2, 8>}, {pipeline_mode = #tpu.pipeline_mode<synchronous>, transform_indices = @transform_1, window_bounds = array<i64: 8, 128>}, {pipeline_mode = #tpu.pipeline_mode<synchronous>, transform_indices = @transform_2, window_bounds = array<i64: 1, 128>}, {pipeline_mode = #tpu.pipeline_mode<synchronous>, transform_indices = @transform_3, window_bounds = array<i64: 5, 16, 32>}, {pipeline_mode = #tpu.pipeline_mode<synchronous>, transform_indices = @transform_4, window_bounds = array<i64: 1, 32>}, {pipeline_mode = #tpu.pipeline_mode<synchronous>, transform_indices = @transform_5, window_bounds = array<i64: 5, 32, 64>}, {pipeline_mode = #tpu.pipeline_mode<synchronous>, transform_indices = @transform_6, window_bounds = array<i64: 1, 64>}, {pipeline_mode = #tpu.pipeline_mode<synchronous>, transform_indices = @transform_7, window_bounds = array<i64: 5, 64, 128>}, {pipeline_mode = #tpu.pipeline_mode<synchronous>, transform_indices = @transform_8, window_bounds = array<i64: 1, 128>}, {pipeline_mode = #tpu.pipeline_mode<synchronous>, transform_indices = @transform_9, window_bounds = array<i64: 1024, 100>}, {pipeline_mode = #tpu.pipeline_mode<synchronous>, transform_indices = @transform_10, window_bounds = array<i64: 1, 100>}, {pipeline_mode = #tpu.pipeline_mode<synchronous>, transform_indices = @transform_11, window_bounds = array<i64: 100, 64>}, {pipeline_mode = #tpu.pipeline_mode<synchronous>, transform_indices = @transform_12, window_bounds = array<i64: 1, 64>}, {pipeline_mode = #tpu.pipeline_mode<synchronous>, transform_indices = @transform_13, window_bounds = array<i64: 64, 1>}, {pipeline_mode = #tpu.pipeline_mode<synchronous>, transform_indices = @transform_14, window_bounds = array<i64: 1, 1>}, {transform_indices = @transform_15, window_bounds = array<i64: 2, 1>}]} {
    %cst = arith.constant 0.000000e+00 : f32
    %0 = vector.broadcast %cst : f32 to vector<2x2x64xf32>
    %c0 = arith.constant 0 : index
    %c0_0 = arith.constant 0 : index
    %c0_1 = arith.constant 0 : index
    %1 = vector.load %arg17[%c0, %c0_0, %c0_1] : memref<2x12x64xf32, #tpu.memory_space<vmem>>, vector<2x2x64xf32>
    tpu.vector_store %arg17[%c0, %c0_0, %c0_1], %0 {strides = array<i32>} : memref<2x12x64xf32, #tpu.memory_space<vmem>>, vector<2x2x64xf32>,
    %cst_2 = arith.constant 0.000000e+00 : f32
    %2 = vector.broadcast %cst_2 : f32 to vector<2x2x64xf32>
    %c0_3 = arith.constant 0 : index
    %c10 = arith.constant 10 : index
    %c0_4 = arith.constant 0 : index
    %3 = vector.load %arg17[%c0_3, %c10, %c0_4] : memref<2x12x64xf32, #tpu.memory_space<vmem>>, vector<2x2x64xf32>
    tpu.vector_store %arg17[%c0_3, %c10, %c0_4], %2 {strides = array<i32>} : memref<2x12x64xf32, #tpu.memory_space<vmem>>, vector<2x2x64xf32>,
    %c0_5 = arith.constant 0 : index
    %c0_6 = arith.constant 0 : index
    %4 = vector.load %arg1[%c0_5, %c0_6] : memref<2x8xf32, #tpu.memory_space<vmem>>, vector<2x8xf32>
    %c0_7 = arith.constant 0 : index
    %c0_8 = arith.constant 0 : index
    %5 = vector.load %arg2[%c0_7, %c0_8] : memref<8x128xf32, #tpu.memory_space<vmem>>, vector<8x128xf32>
    %cst_9 = arith.constant dense<0.000000e+00> : vector<2x128xf32>
    %6 = tpu.matmul %4, %5, %cst_9 {dimension_numbers = #tpu.dot_dimension_numbers<[1], [0], [0], [1], [0, 0, 1, 1], [], []>} : vector<2x8xf32>, vector<8x128xf32>, vector<2x128xf32> -> vector<2x128xf32>
    %c0_10 = arith.constant 0 : index
    %c0_11 = arith.constant 0 : index
    %7 = vector.load %arg3[%c0_10, %c0_11] : memref<1x128xf32, #tpu.memory_space<vmem>>, vector<1x128xf32>
    %8 = vector.broadcast %7 : vector<1x128xf32> to vector<2x128xf32>
    %9 = arith.addf %6, %8 : vector<2x128xf32>
    %cst_12 = arith.constant 0.000000e+00 : f32
    %10 = vector.broadcast %cst_12 : f32 to vector<2x128xf32>
    %11 = arith.maximumf %9, %10 : vector<2x128xf32>
    %12 = vector.shape_cast %11 : vector<2x128xf32> to vector<2x8x16xf32>
    %c0_13 = arith.constant 0 : index
    %c2 = arith.constant 2 : index
    %c0_14 = arith.constant 0 : index
    %13 = vector.load %arg17[%c0_13, %c2, %c0_14] : memref<2x12x64xf32, #tpu.memory_space<vmem>>, vector<2x8x16xf32>
    tpu.vector_store %arg17[%c0_13, %c2, %c0_14], %12 {strides = array<i32>} : memref<2x12x64xf32, #tpu.memory_space<vmem>>, vector<2x8x16xf32>,
    %cst_15 = arith.constant 0.000000e+00 : f32
    %14 = vector.broadcast %cst_15 : f32 to vector<16x32xf32>
    %c0_16 = arith.constant 0 : index
    %c0_17 = arith.constant 0 : index
    %c0_18 = arith.constant 0 : index
    %15 = vector.load %arg17[%c0_16, %c0_17, %c0_18] : memref<2x12x64xf32, #tpu.memory_space<vmem>>, vector<2x8x16xf32>
    %16 = vector.shape_cast %15 : vector<2x8x16xf32> to vector<16x16xf32>
    %c0_19 = arith.constant 0 : index
    %c0_20 = arith.constant 0 : index
    %c0_21 = arith.constant 0 : index
    %17 = vector.load %arg4[%c0_19, %c0_20, %c0_21] : memref<5x16x32xf32, #tpu.memory_space<vmem>>, vector<1x16x32xf32>
    %18 = vector.shape_cast %17 : vector<1x16x32xf32> to vector<16x32xf32>
    %cst_22 = arith.constant dense<0.000000e+00> : vector<16x32xf32>
    %19 = tpu.matmul %16, %18, %cst_22 {dimension_numbers = #tpu.dot_dimension_numbers<[1], [0], [0], [1], [0, 0, 1, 1], [], []>} : vector<16x16xf32>, vector<16x32xf32>, vector<16x32xf32> -> vector<16x32xf32>
    %20 = arith.addf %14, %19 : vector<16x32xf32>
    %c0_23 = arith.constant 0 : index
    %c1 = arith.constant 1 : index
    %c0_24 = arith.constant 0 : index
    %21 = vector.load %arg17[%c0_23, %c1, %c0_24] : memref<2x12x64xf32, #tpu.memory_space<vmem>>, vector<2x8x16xf32>
    %22 = vector.shape_cast %21 : vector<2x8x16xf32> to vector<16x16xf32>
    %c1_25 = arith.constant 1 : index
    %c0_26 = arith.constant 0 : index
    %c0_27 = arith.constant 0 : index
    %23 = vector.load %arg4[%c1_25, %c0_26, %c0_27] : memref<5x16x32xf32, #tpu.memory_space<vmem>>, vector<1x16x32xf32>
    %24 = vector.shape_cast %23 : vector<1x16x32xf32> to vector<16x32xf32>
    %cst_28 = arith.constant dense<0.000000e+00> : vector<16x32xf32>
    %25 = tpu.matmul %22, %24, %cst_28 {dimension_numbers = #tpu.dot_dimension_numbers<[1], [0], [0], [1], [0, 0, 1, 1], [], []>} : vector<16x16xf32>, vector<16x32xf32>, vector<16x32xf32> -> vector<16x32xf32>
    %26 = arith.addf %20, %25 : vector<16x32xf32>
    %c0_29 = arith.constant 0 : index
    %c2_30 = arith.constant 2 : index
    %c0_31 = arith.constant 0 : index
    %27 = vector.load %arg17[%c0_29, %c2_30, %c0_31] : memref<2x12x64xf32, #tpu.memory_space<vmem>>, vector<2x8x16xf32>
    %28 = vector.shape_cast %27 : vector<2x8x16xf32> to vector<16x16xf32>
    %c2_32 = arith.constant 2 : index
    %c0_33 = arith.constant 0 : index
    %c0_34 = arith.constant 0 : index
    %29 = vector.load %arg4[%c2_32, %c0_33, %c0_34] : memref<5x16x32xf32, #tpu.memory_space<vmem>>, vector<1x16x32xf32>
    %30 = vector.shape_cast %29 : vector<1x16x32xf32> to vector<16x32xf32>
    %cst_35 = arith.constant dense<0.000000e+00> : vector<16x32xf32>
    %31 = tpu.matmul %28, %30, %cst_35 {dimension_numbers = #tpu.dot_dimension_numbers<[1], [0], [0], [1], [0, 0, 1, 1], [], []>} : vector<16x16xf32>, vector<16x32xf32>, vector<16x32xf32> -> vector<16x32xf32>
    %32 = arith.addf %26, %31 : vector<16x32xf32>
    %c0_36 = arith.constant 0 : index
    %c3 = arith.constant 3 : index
    %c0_37 = arith.constant 0 : index
    %33 = vector.load %arg17[%c0_36, %c3, %c0_37] : memref<2x12x64xf32, #tpu.memory_space<vmem>>, vector<2x8x16xf32>
    %34 = vector.shape_cast %33 : vector<2x8x16xf32> to vector<16x16xf32>
    %c3_38 = arith.constant 3 : index
    %c0_39 = arith.constant 0 : index
    %c0_40 = arith.constant 0 : index
    %35 = vector.load %arg4[%c3_38, %c0_39, %c0_40] : memref<5x16x32xf32, #tpu.memory_space<vmem>>, vector<1x16x32xf32>
    %36 = vector.shape_cast %35 : vector<1x16x32xf32> to vector<16x32xf32>
    %cst_41 = arith.constant dense<0.000000e+00> : vector<16x32xf32>
    %37 = tpu.matmul %34, %36, %cst_41 {dimension_numbers = #tpu.dot_dimension_numbers<[1], [0], [0], [1], [0, 0, 1, 1], [], []>} : vector<16x16xf32>, vector<16x32xf32>, vector<16x32xf32> -> vector<16x32xf32>
    %38 = arith.addf %32, %37 : vector<16x32xf32>
    %c0_42 = arith.constant 0 : index
    %c4 = arith.constant 4 : index
    %c0_43 = arith.constant 0 : index
    %39 = vector.load %arg17[%c0_42, %c4, %c0_43] : memref<2x12x64xf32, #tpu.memory_space<vmem>>, vector<2x8x16xf32>
    %40 = vector.shape_cast %39 : vector<2x8x16xf32> to vector<16x16xf32>
    %c4_44 = arith.constant 4 : index
    %c0_45 = arith.constant 0 : index
    %c0_46 = arith.constant 0 : index
    %41 = vector.load %arg4[%c4_44, %c0_45, %c0_46] : memref<5x16x32xf32, #tpu.memory_space<vmem>>, vector<1x16x32xf32>
    %42 = vector.shape_cast %41 : vector<1x16x32xf32> to vector<16x32xf32>
    %cst_47 = arith.constant dense<0.000000e+00> : vector<16x32xf32>
    %43 = tpu.matmul %40, %42, %cst_47 {dimension_numbers = #tpu.dot_dimension_numbers<[1], [0], [0], [1], [0, 0, 1, 1], [], []>} : vector<16x16xf32>, vector<16x32xf32>, vector<16x32xf32> -> vector<16x32xf32>
    %44 = arith.addf %38, %43 : vector<16x32xf32>
    %c0_48 = arith.constant 0 : index
    %c0_49 = arith.constant 0 : index
    %45 = vector.load %arg5[%c0_48, %c0_49] : memref<1x32xf32, #tpu.memory_space<vmem>>, vector<1x32xf32>
    %46 = vector.broadcast %45 : vector<1x32xf32> to vector<16x32xf32>
    %47 = arith.addf %44, %46 : vector<16x32xf32>
    %cst_50 = arith.constant 0.000000e+00 : f32
    %48 = vector.broadcast %cst_50 : f32 to vector<16x32xf32>
    %49 = arith.maximumf %47, %48 : vector<16x32xf32>
    %50 = vector.shape_cast %49 : vector<16x32xf32> to vector<2x8x32xf32>
    %c0_51 = arith.constant 0 : index
    %c2_52 = arith.constant 2 : index
    %c0_53 = arith.constant 0 : index
    %51 = vector.load %arg17[%c0_51, %c2_52, %c0_53] : memref<2x12x64xf32, #tpu.memory_space<vmem>>, vector<2x8x32xf32>
    tpu.vector_store %arg17[%c0_51, %c2_52, %c0_53], %50 {strides = array<i32>} : memref<2x12x64xf32, #tpu.memory_space<vmem>>, vector<2x8x32xf32>,
    %cst_54 = arith.constant 0.000000e+00 : f32
    %52 = vector.broadcast %cst_54 : f32 to vector<16x64xf32>
    %c0_55 = arith.constant 0 : index
    %c0_56 = arith.constant 0 : index
    %c0_57 = arith.constant 0 : index
    %53 = vector.load %arg17[%c0_55, %c0_56, %c0_57] : memref<2x12x64xf32, #tpu.memory_space<vmem>>, vector<2x8x32xf32>
    %54 = vector.shape_cast %53 : vector<2x8x32xf32> to vector<16x32xf32>
    %c0_58 = arith.constant 0 : index
    %c0_59 = arith.constant 0 : index
    %c0_60 = arith.constant 0 : index
    %55 = vector.load %arg6[%c0_58, %c0_59, %c0_60] : memref<5x32x64xf32, #tpu.memory_space<vmem>>, vector<1x32x64xf32>
    %56 = vector.shape_cast %55 : vector<1x32x64xf32> to vector<32x64xf32>
    %cst_61 = arith.constant dense<0.000000e+00> : vector<16x64xf32>
    %57 = tpu.matmul %54, %56, %cst_61 {dimension_numbers = #tpu.dot_dimension_numbers<[1], [0], [0], [1], [0, 0, 1, 1], [], []>} : vector<16x32xf32>, vector<32x64xf32>, vector<16x64xf32> -> vector<16x64xf32>
    %58 = arith.addf %52, %57 : vector<16x64xf32>
    %c0_62 = arith.constant 0 : index
    %c1_63 = arith.constant 1 : index
    %c0_64 = arith.constant 0 : index
    %59 = vector.load %arg17[%c0_62, %c1_63, %c0_64] : memref<2x12x64xf32, #tpu.memory_space<vmem>>, vector<2x8x32xf32>
    %60 = vector.shape_cast %59 : vector<2x8x32xf32> to vector<16x32xf32>
    %c1_65 = arith.constant 1 : index
    %c0_66 = arith.constant 0 : index
    %c0_67 = arith.constant 0 : index
    %61 = vector.load %arg6[%c1_65, %c0_66, %c0_67] : memref<5x32x64xf32, #tpu.memory_space<vmem>>, vector<1x32x64xf32>
    %62 = vector.shape_cast %61 : vector<1x32x64xf32> to vector<32x64xf32>
    %cst_68 = arith.constant dense<0.000000e+00> : vector<16x64xf32>
    %63 = tpu.matmul %60, %62, %cst_68 {dimension_numbers = #tpu.dot_dimension_numbers<[1], [0], [0], [1], [0, 0, 1, 1], [], []>} : vector<16x32xf32>, vector<32x64xf32>, vector<16x64xf32> -> vector<16x64xf32>
    %64 = arith.addf %58, %63 : vector<16x64xf32>
    %c0_69 = arith.constant 0 : index
    %c2_70 = arith.constant 2 : index
    %c0_71 = arith.constant 0 : index
    %65 = vector.load %arg17[%c0_69, %c2_70, %c0_71] : memref<2x12x64xf32, #tpu.memory_space<vmem>>, vector<2x8x32xf32>
    %66 = vector.shape_cast %65 : vector<2x8x32xf32> to vector<16x32xf32>
    %c2_72 = arith.constant 2 : index
    %c0_73 = arith.constant 0 : index
    %c0_74 = arith.constant 0 : index
    %67 = vector.load %arg6[%c2_72, %c0_73, %c0_74] : memref<5x32x64xf32, #tpu.memory_space<vmem>>, vector<1x32x64xf32>
    %68 = vector.shape_cast %67 : vector<1x32x64xf32> to vector<32x64xf32>
    %cst_75 = arith.constant dense<0.000000e+00> : vector<16x64xf32>
    %69 = tpu.matmul %66, %68, %cst_75 {dimension_numbers = #tpu.dot_dimension_numbers<[1], [0], [0], [1], [0, 0, 1, 1], [], []>} : vector<16x32xf32>, vector<32x64xf32>, vector<16x64xf32> -> vector<16x64xf32>
    %70 = arith.addf %64, %69 : vector<16x64xf32>
    %c0_76 = arith.constant 0 : index
    %c3_77 = arith.constant 3 : index
    %c0_78 = arith.constant 0 : index
    %71 = vector.load %arg17[%c0_76, %c3_77, %c0_78] : memref<2x12x64xf32, #tpu.memory_space<vmem>>, vector<2x8x32xf32>
    %72 = vector.shape_cast %71 : vector<2x8x32xf32> to vector<16x32xf32>
    %c3_79 = arith.constant 3 : index
    %c0_80 = arith.constant 0 : index
    %c0_81 = arith.constant 0 : index
    %73 = vector.load %arg6[%c3_79, %c0_80, %c0_81] : memref<5x32x64xf32, #tpu.memory_space<vmem>>, vector<1x32x64xf32>
    %74 = vector.shape_cast %73 : vector<1x32x64xf32> to vector<32x64xf32>
    %cst_82 = arith.constant dense<0.000000e+00> : vector<16x64xf32>
    %75 = tpu.matmul %72, %74, %cst_82 {dimension_numbers = #tpu.dot_dimension_numbers<[1], [0], [0], [1], [0, 0, 1, 1], [], []>} : vector<16x32xf32>, vector<32x64xf32>, vector<16x64xf32> -> vector<16x64xf32>
    %76 = arith.addf %70, %75 : vector<16x64xf32>
    %c0_83 = arith.constant 0 : index
    %c4_84 = arith.constant 4 : index
    %c0_85 = arith.constant 0 : index
    %77 = vector.load %arg17[%c0_83, %c4_84, %c0_85] : memref<2x12x64xf32, #tpu.memory_space<vmem>>, vector<2x8x32xf32>
    %78 = vector.shape_cast %77 : vector<2x8x32xf32> to vector<16x32xf32>
    %c4_86 = arith.constant 4 : index
    %c0_87 = arith.constant 0 : index
    %c0_88 = arith.constant 0 : index
    %79 = vector.load %arg6[%c4_86, %c0_87, %c0_88] : memref<5x32x64xf32, #tpu.memory_space<vmem>>, vector<1x32x64xf32>
    %80 = vector.shape_cast %79 : vector<1x32x64xf32> to vector<32x64xf32>
    %cst_89 = arith.constant dense<0.000000e+00> : vector<16x64xf32>
    %81 = tpu.matmul %78, %80, %cst_89 {dimension_numbers = #tpu.dot_dimension_numbers<[1], [0], [0], [1], [0, 0, 1, 1], [], []>} : vector<16x32xf32>, vector<32x64xf32>, vector<16x64xf32> -> vector<16x64xf32>
    %82 = arith.addf %76, %81 : vector<16x64xf32>
    %c0_90 = arith.constant 0 : index
    %c0_91 = arith.constant 0 : index
    %83 = vector.load %arg7[%c0_90, %c0_91] : memref<1x64xf32, #tpu.memory_space<vmem>>, vector<1x64xf32>
    %84 = vector.broadcast %83 : vector<1x64xf32> to vector<16x64xf32>
    %85 = arith.addf %82, %84 : vector<16x64xf32>
    %cst_92 = arith.constant 0.000000e+00 : f32
    %86 = vector.broadcast %cst_92 : f32 to vector<16x64xf32>
    %87 = arith.maximumf %85, %86 : vector<16x64xf32>
    %88 = vector.shape_cast %87 : vector<16x64xf32> to vector<2x8x64xf32>
    %c0_93 = arith.constant 0 : index
    %c2_94 = arith.constant 2 : index
    %c0_95 = arith.constant 0 : index
    %89 = vector.load %arg17[%c0_93, %c2_94, %c0_95] : memref<2x12x64xf32, #tpu.memory_space<vmem>>, vector<2x8x64xf32>
    tpu.vector_store %arg17[%c0_93, %c2_94, %c0_95], %88 {strides = array<i32>} : memref<2x12x64xf32, #tpu.memory_space<vmem>>, vector<2x8x64xf32>,
    %cst_96 = arith.constant 0.000000e+00 : f32
    %90 = vector.broadcast %cst_96 : f32 to vector<16x128xf32>
    %c0_97 = arith.constant 0 : index
    %c0_98 = arith.constant 0 : index
    %c0_99 = arith.constant 0 : index
    %91 = vector.load %arg17[%c0_97, %c0_98, %c0_99] : memref<2x12x64xf32, #tpu.memory_space<vmem>>, vector<2x8x64xf32>
    %92 = vector.shape_cast %91 : vector<2x8x64xf32> to vector<16x64xf32>
    %c0_100 = arith.constant 0 : index
    %c0_101 = arith.constant 0 : index
    %c0_102 = arith.constant 0 : index
    %93 = vector.load %arg8[%c0_100, %c0_101, %c0_102] : memref<5x64x128xf32, #tpu.memory_space<vmem>>, vector<1x64x128xf32>
    %94 = vector.shape_cast %93 : vector<1x64x128xf32> to vector<64x128xf32>
    %cst_103 = arith.constant dense<0.000000e+00> : vector<16x128xf32>
    %95 = tpu.matmul %92, %94, %cst_103 {dimension_numbers = #tpu.dot_dimension_numbers<[1], [0], [0], [1], [0, 0, 1, 1], [], []>} : vector<16x64xf32>, vector<64x128xf32>, vector<16x128xf32> -> vector<16x128xf32>
    %96 = arith.addf %90, %95 : vector<16x128xf32>
    %c0_104 = arith.constant 0 : index
    %c1_105 = arith.constant 1 : index
    %c0_106 = arith.constant 0 : index
    %97 = vector.load %arg17[%c0_104, %c1_105, %c0_106] : memref<2x12x64xf32, #tpu.memory_space<vmem>>, vector<2x8x64xf32>
    %98 = vector.shape_cast %97 : vector<2x8x64xf32> to vector<16x64xf32>
    %c1_107 = arith.constant 1 : index
    %c0_108 = arith.constant 0 : index
    %c0_109 = arith.constant 0 : index
    %99 = vector.load %arg8[%c1_107, %c0_108, %c0_109] : memref<5x64x128xf32, #tpu.memory_space<vmem>>, vector<1x64x128xf32>
    %100 = vector.shape_cast %99 : vector<1x64x128xf32> to vector<64x128xf32>
    %cst_110 = arith.constant dense<0.000000e+00> : vector<16x128xf32>
    %101 = tpu.matmul %98, %100, %cst_110 {dimension_numbers = #tpu.dot_dimension_numbers<[1], [0], [0], [1], [0, 0, 1, 1], [], []>} : vector<16x64xf32>, vector<64x128xf32>, vector<16x128xf32> -> vector<16x128xf32>
    %102 = arith.addf %96, %101 : vector<16x128xf32>
    %c0_111 = arith.constant 0 : index
    %c2_112 = arith.constant 2 : index
    %c0_113 = arith.constant 0 : index
    %103 = vector.load %arg17[%c0_111, %c2_112, %c0_113] : memref<2x12x64xf32, #tpu.memory_space<vmem>>, vector<2x8x64xf32>
    %104 = vector.shape_cast %103 : vector<2x8x64xf32> to vector<16x64xf32>
    %c2_114 = arith.constant 2 : index
    %c0_115 = arith.constant 0 : index
    %c0_116 = arith.constant 0 : index
    %105 = vector.load %arg8[%c2_114, %c0_115, %c0_116] : memref<5x64x128xf32, #tpu.memory_space<vmem>>, vector<1x64x128xf32>
    %106 = vector.shape_cast %105 : vector<1x64x128xf32> to vector<64x128xf32>
    %cst_117 = arith.constant dense<0.000000e+00> : vector<16x128xf32>
    %107 = tpu.matmul %104, %106, %cst_117 {dimension_numbers = #tpu.dot_dimension_numbers<[1], [0], [0], [1], [0, 0, 1, 1], [], []>} : vector<16x64xf32>, vector<64x128xf32>, vector<16x128xf32> -> vector<16x128xf32>
    %108 = arith.addf %102, %107 : vector<16x128xf32>
    %c0_118 = arith.constant 0 : index
    %c3_119 = arith.constant 3 : index
    %c0_120 = arith.constant 0 : index
    %109 = vector.load %arg17[%c0_118, %c3_119, %c0_120] : memref<2x12x64xf32, #tpu.memory_space<vmem>>, vector<2x8x64xf32>
    %110 = vector.shape_cast %109 : vector<2x8x64xf32> to vector<16x64xf32>
    %c3_121 = arith.constant 3 : index
    %c0_122 = arith.constant 0 : index
    %c0_123 = arith.constant 0 : index
    %111 = vector.load %arg8[%c3_121, %c0_122, %c0_123] : memref<5x64x128xf32, #tpu.memory_space<vmem>>, vector<1x64x128xf32>
    %112 = vector.shape_cast %111 : vector<1x64x128xf32> to vector<64x128xf32>
    %cst_124 = arith.constant dense<0.000000e+00> : vector<16x128xf32>
    %113 = tpu.matmul %110, %112, %cst_124 {dimension_numbers = #tpu.dot_dimension_numbers<[1], [0], [0], [1], [0, 0, 1, 1], [], []>} : vector<16x64xf32>, vector<64x128xf32>, vector<16x128xf32> -> vector<16x128xf32>
    %114 = arith.addf %108, %113 : vector<16x128xf32>
    %c0_125 = arith.constant 0 : index
    %c4_126 = arith.constant 4 : index
    %c0_127 = arith.constant 0 : index
    %115 = vector.load %arg17[%c0_125, %c4_126, %c0_127] : memref<2x12x64xf32, #tpu.memory_space<vmem>>, vector<2x8x64xf32>
    %116 = vector.shape_cast %115 : vector<2x8x64xf32> to vector<16x64xf32>
    %c4_128 = arith.constant 4 : index
    %c0_129 = arith.constant 0 : index
    %c0_130 = arith.constant 0 : index
    %117 = vector.load %arg8[%c4_128, %c0_129, %c0_130] : memref<5x64x128xf32, #tpu.memory_space<vmem>>, vector<1x64x128xf32>
    %118 = vector.shape_cast %117 : vector<1x64x128xf32> to vector<64x128xf32>
    %cst_131 = arith.constant dense<0.000000e+00> : vector<16x128xf32>
    %119 = tpu.matmul %116, %118, %cst_131 {dimension_numbers = #tpu.dot_dimension_numbers<[1], [0], [0], [1], [0, 0, 1, 1], [], []>} : vector<16x64xf32>, vector<64x128xf32>, vector<16x128xf32> -> vector<16x128xf32>
    %120 = arith.addf %114, %119 : vector<16x128xf32>
    %c0_132 = arith.constant 0 : index
    %c0_133 = arith.constant 0 : index
    %121 = vector.load %arg9[%c0_132, %c0_133] : memref<1x128xf32, #tpu.memory_space<vmem>>, vector<1x128xf32>
    %122 = vector.broadcast %121 : vector<1x128xf32> to vector<16x128xf32>
    %123 = arith.addf %120, %122 : vector<16x128xf32>
    %124 = vector.shape_cast %123 : vector<16x128xf32> to vector<2x8x128xf32>
    %125 = vector.extract_strided_slice %124 {offsets = [0, 0, 0], sizes = [2, 1, 128], strides = [1, 1, 1]} : vector<2x8x128xf32> to vector<2x1x128xf32>
    %126 = vector.shape_cast %125 : vector<2x1x128xf32> to vector<2x128xf32>
    %c0_134 = arith.constant 0 : index
    %c0_135 = arith.constant 0 : index
    %127 = vector.load %arg18[%c0_134, %c0_135] : memref<2x1024xf32, #tpu.memory_space<vmem>>, vector<2x128xf32>
    tpu.vector_store %arg18[%c0_134, %c0_135], %126 {strides = array<i32>} : memref<2x1024xf32, #tpu.memory_space<vmem>>, vector<2x128xf32>,
    %128 = vector.extract_strided_slice %124 {offsets = [0, 1, 0], sizes = [2, 1, 128], strides = [1, 1, 1]} : vector<2x8x128xf32> to vector<2x1x128xf32>
    %129 = vector.shape_cast %128 : vector<2x1x128xf32> to vector<2x128xf32>
    %c0_136 = arith.constant 0 : index
    %c128 = arith.constant 128 : index
    %130 = vector.load %arg18[%c0_136, %c128] : memref<2x1024xf32, #tpu.memory_space<vmem>>, vector<2x128xf32>
    tpu.vector_store %arg18[%c0_136, %c128], %129 {strides = array<i32>} : memref<2x1024xf32, #tpu.memory_space<vmem>>, vector<2x128xf32>,
    %131 = vector.extract_strided_slice %124 {offsets = [0, 2, 0], sizes = [2, 1, 128], strides = [1, 1, 1]} : vector<2x8x128xf32> to vector<2x1x128xf32>
    %132 = vector.shape_cast %131 : vector<2x1x128xf32> to vector<2x128xf32>
    %c0_137 = arith.constant 0 : index
    %c256 = arith.constant 256 : index
    %133 = vector.load %arg18[%c0_137, %c256] : memref<2x1024xf32, #tpu.memory_space<vmem>>, vector<2x128xf32>
    tpu.vector_store %arg18[%c0_137, %c256], %132 {strides = array<i32>} : memref<2x1024xf32, #tpu.memory_space<vmem>>, vector<2x128xf32>,
    %134 = vector.extract_strided_slice %124 {offsets = [0, 3, 0], sizes = [2, 1, 128], strides = [1, 1, 1]} : vector<2x8x128xf32> to vector<2x1x128xf32>
    %135 = vector.shape_cast %134 : vector<2x1x128xf32> to vector<2x128xf32>
    %c0_138 = arith.constant 0 : index
    %c384 = arith.constant 384 : index
    %136 = vector.load %arg18[%c0_138, %c384] : memref<2x1024xf32, #tpu.memory_space<vmem>>, vector<2x128xf32>
    tpu.vector_store %arg18[%c0_138, %c384], %135 {strides = array<i32>} : memref<2x1024xf32, #tpu.memory_space<vmem>>, vector<2x128xf32>,
    %137 = vector.extract_strided_slice %124 {offsets = [0, 4, 0], sizes = [2, 1, 128], strides = [1, 1, 1]} : vector<2x8x128xf32> to vector<2x1x128xf32>
    %138 = vector.shape_cast %137 : vector<2x1x128xf32> to vector<2x128xf32>
    %c0_139 = arith.constant 0 : index
    %c512 = arith.constant 512 : index
    %139 = vector.load %arg18[%c0_139, %c512] : memref<2x1024xf32, #tpu.memory_space<vmem>>, vector<2x128xf32>
    tpu.vector_store %arg18[%c0_139, %c512], %138 {strides = array<i32>} : memref<2x1024xf32, #tpu.memory_space<vmem>>, vector<2x128xf32>,
    %140 = vector.extract_strided_slice %124 {offsets = [0, 5, 0], sizes = [2, 1, 128], strides = [1, 1, 1]} : vector<2x8x128xf32> to vector<2x1x128xf32>
    %141 = vector.shape_cast %140 : vector<2x1x128xf32> to vector<2x128xf32>
    %c0_140 = arith.constant 0 : index
    %c640 = arith.constant 640 : index
    %142 = vector.load %arg18[%c0_140, %c640] : memref<2x1024xf32, #tpu.memory_space<vmem>>, vector<2x128xf32>
    tpu.vector_store %arg18[%c0_140, %c640], %141 {strides = array<i32>} : memref<2x1024xf32, #tpu.memory_space<vmem>>, vector<2x128xf32>,
    %143 = vector.extract_strided_slice %124 {offsets = [0, 6, 0], sizes = [2, 1, 128], strides = [1, 1, 1]} : vector<2x8x128xf32> to vector<2x1x128xf32>
    %144 = vector.shape_cast %143 : vector<2x1x128xf32> to vector<2x128xf32>
    %c0_141 = arith.constant 0 : index
    %c768 = arith.constant 768 : index
    %145 = vector.load %arg18[%c0_141, %c768] : memref<2x1024xf32, #tpu.memory_space<vmem>>, vector<2x128xf32>
    tpu.vector_store %arg18[%c0_141, %c768], %144 {strides = array<i32>} : memref<2x1024xf32, #tpu.memory_space<vmem>>, vector<2x128xf32>,
    %146 = vector.extract_strided_slice %124 {offsets = [0, 7, 0], sizes = [2, 1, 128], strides = [1, 1, 1]} : vector<2x8x128xf32> to vector<2x1x128xf32>
    %147 = vector.shape_cast %146 : vector<2x1x128xf32> to vector<2x128xf32>
    %c0_142 = arith.constant 0 : index
    %c896 = arith.constant 896 : index
    %148 = vector.load %arg18[%c0_142, %c896] : memref<2x1024xf32, #tpu.memory_space<vmem>>, vector<2x128xf32>
    tpu.vector_store %arg18[%c0_142, %c896], %147 {strides = array<i32>} : memref<2x1024xf32, #tpu.memory_space<vmem>>, vector<2x128xf32>,
    %c0_143 = arith.constant 0 : index
    %c0_144 = arith.constant 0 : index
    %149 = vector.load %arg18[%c0_143, %c0_144] : memref<2x1024xf32, #tpu.memory_space<vmem>>, vector<2x1024xf32>
    %c0_145 = arith.constant 0 : index
    %c0_146 = arith.constant 0 : index
    %150 = vector.load %arg10[%c0_145, %c0_146] : memref<1024x100xf32, #tpu.memory_space<vmem>>, vector<1024x100xf32>
    %cst_147 = arith.constant dense<0.000000e+00> : vector<2x100xf32>
    %151 = tpu.matmul %149, %150, %cst_147 {dimension_numbers = #tpu.dot_dimension_numbers<[1], [0], [0], [1], [0, 0, 1, 1], [], []>} : vector<2x1024xf32>, vector<1024x100xf32>, vector<2x100xf32> -> vector<2x100xf32>
    %c0_148 = arith.constant 0 : index
    %c0_149 = arith.constant 0 : index
    %152 = vector.load %arg11[%c0_148, %c0_149] : memref<1x100xf32, #tpu.memory_space<vmem>>, vector<1x100xf32>
    %153 = vector.broadcast %152 : vector<1x100xf32> to vector<2x100xf32>
    %154 = arith.addf %151, %153 : vector<2x100xf32>
    %c0_150 = arith.constant 0 : index
    %c0_151 = arith.constant 0 : index
    %155 = vector.load %arg12[%c0_150, %c0_151] : memref<100x64xf32, #tpu.memory_space<vmem>>, vector<100x64xf32>
    %cst_152 = arith.constant dense<0.000000e+00> : vector<2x64xf32>
    %156 = tpu.matmul %154, %155, %cst_152 {dimension_numbers = #tpu.dot_dimension_numbers<[1], [0], [0], [1], [0, 0, 1, 1], [], []>} : vector<2x100xf32>, vector<100x64xf32>, vector<2x64xf32> -> vector<2x64xf32>
    %c0_153 = arith.constant 0 : index
    %c0_154 = arith.constant 0 : index
    %157 = vector.load %arg13[%c0_153, %c0_154] : memref<1x64xf32, #tpu.memory_space<vmem>>, vector<1x64xf32>
    %158 = vector.broadcast %157 : vector<1x64xf32> to vector<2x64xf32>
    %159 = arith.addf %156, %158 : vector<2x64xf32>
    %c0_155 = arith.constant 0 : index
    %c0_156 = arith.constant 0 : index
    %160 = vector.load %arg14[%c0_155, %c0_156] : memref<64x1xf32, #tpu.memory_space<vmem>>, vector<64x1xf32>
    %cst_157 = arith.constant dense<0.000000e+00> : vector<2x1xf32>
    %161 = tpu.matmul %159, %160, %cst_157 {dimension_numbers = #tpu.dot_dimension_numbers<[1], [0], [0], [1], [0, 0, 1, 1], [], []>} : vector<2x64xf32>, vector<64x1xf32>, vector<2x1xf32> -> vector<2x1xf32>
    %c0_158 = arith.constant 0 : index
    %c0_159 = arith.constant 0 : index
    %162 = vector.load %arg15[%c0_158, %c0_159] : memref<1x1xf32, #tpu.memory_space<vmem>>, vector<1x1xf32>
    %163 = vector.broadcast %162 : vector<1x1xf32> to vector<2x1xf32>
    %164 = arith.addf %161, %163 : vector<2x1xf32>
    %c0_160 = arith.constant 0 : index
    %c0_161 = arith.constant 0 : index
    %165 = vector.load %arg16[%c0_160, %c0_161] : memref<2x1xf32, #tpu.memory_space<vmem>>, vector<2x1xf32>
    tpu.vector_store %arg16[%c0_160, %c0_161], %164 {strides = array<i32>} : memref<2x1xf32, #tpu.memory_space<vmem>>, vector<2x1xf32>,
    return
  }
  func.func @transform_0(%arg0: i32) -> (i32, i32) {
    %c0_i32 = arith.constant 0 : i32
    %c0_i32_0 = arith.constant 0 : i32
    return %arg0, %c0_i32 : i32, i32
  }
  func.func @transform_1(%arg0: i32) -> (i32, i32) {
    %c0_i32 = arith.constant 0 : i32
    %c0_i32_0 = arith.constant 0 : i32
    %c0_i32_1 = arith.constant 0 : i32
    return %c0_i32, %c0_i32_0 : i32, i32
  }
  func.func @transform_2(%arg0: i32) -> (i32, i32) {
    %c0_i32 = arith.constant 0 : i32
    %c0_i32_0 = arith.constant 0 : i32
    %c0_i32_1 = arith.constant 0 : i32
    return %c0_i32, %c0_i32_0 : i32, i32
  }
  func.func @transform_3(%arg0: i32) -> (i32, i32, i32) {
    %c0_i32 = arith.constant 0 : i32
    %c0_i32_0 = arith.constant 0 : i32
    %c0_i32_1 = arith.constant 0 : i32
    %c0_i32_2 = arith.constant 0 : i32
    return %c0_i32, %c0_i32_0, %c0_i32_1 : i32, i32, i32
  }
  func.func @transform_4(%arg0: i32) -> (i32, i32) {
    %c0_i32 = arith.constant 0 : i32
    %c0_i32_0 = arith.constant 0 : i32
    %c0_i32_1 = arith.constant 0 : i32
    return %c0_i32, %c0_i32_0 : i32, i32
  }
  func.func @transform_5(%arg0: i32) -> (i32, i32, i32) {
    %c0_i32 = arith.constant 0 : i32
    %c0_i32_0 = arith.constant 0 : i32
    %c0_i32_1 = arith.constant 0 : i32
    %c0_i32_2 = arith.constant 0 : i32
    return %c0_i32, %c0_i32_0, %c0_i32_1 : i32, i32, i32
  }
  func.func @transform_6(%arg0: i32) -> (i32, i32) {
    %c0_i32 = arith.constant 0 : i32
    %c0_i32_0 = arith.constant 0 : i32
    %c0_i32_1 = arith.constant 0 : i32
    return %c0_i32, %c0_i32_0 : i32, i32
  }
  func.func @transform_7(%arg0: i32) -> (i32, i32, i32) {
    %c0_i32 = arith.constant 0 : i32
    %c0_i32_0 = arith.constant 0 : i32
    %c0_i32_1 = arith.constant 0 : i32
    %c0_i32_2 = arith.constant 0 : i32
    return %c0_i32, %c0_i32_0, %c0_i32_1 : i32, i32, i32
  }
  func.func @transform_8(%arg0: i32) -> (i32, i32) {
    %c0_i32 = arith.constant 0 : i32
    %c0_i32_0 = arith.constant 0 : i32
    %c0_i32_1 = arith.constant 0 : i32
    return %c0_i32, %c0_i32_0 : i32, i32
  }
  func.func @transform_9(%arg0: i32) -> (i32, i32) {
    %c0_i32 = arith.constant 0 : i32
    %c0_i32_0 = arith.constant 0 : i32
    %c0_i32_1 = arith.constant 0 : i32
    return %c0_i32, %c0_i32_0 : i32, i32
  }
  func.func @transform_10(%arg0: i32) -> (i32, i32) {
    %c0_i32 = arith.constant 0 : i32
    %c0_i32_0 = arith.constant 0 : i32
    %c0_i32_1 = arith.constant 0 : i32
    return %c0_i32, %c0_i32_0 : i32, i32
  }
  func.func @transform_11(%arg0: i32) -> (i32, i32) {
    %c0_i32 = arith.constant 0 : i32
    %c0_i32_0 = arith.constant 0 : i32
    %c0_i32_1 = arith.constant 0 : i32
    return %c0_i32, %c0_i32_0 : i32, i32
  }
  func.func @transform_12(%arg0: i32) -> (i32, i32) {
    %c0_i32 = arith.constant 0 : i32
    %c0_i32_0 = arith.constant 0 : i32
    %c0_i32_1 = arith.constant 0 : i32
    return %c0_i32, %c0_i32_0 : i32, i32
  }
  func.func @transform_13(%arg0: i32) -> (i32, i32) {
    %c0_i32 = arith.constant 0 : i32
    %c0_i32_0 = arith.constant 0 : i32
    %c0_i32_1 = arith.constant 0 : i32
    return %c0_i32, %c0_i32_0 : i32, i32
  }
  func.func @transform_14(%arg0: i32) -> (i32, i32) {
    %c0_i32 = arith.constant 0 : i32
    %c0_i32_0 = arith.constant 0 : i32
    %c0_i32_1 = arith.constant 0 : i32
    return %c0_i32, %c0_i32_0 : i32, i32
  }
  func.func @transform_15(%arg0: i32) -> (i32, i32) {
    %c0_i32 = arith.constant 0 : i32
    %c0_i32_0 = arith.constant 0 : i32
    return %arg0, %c0_i32 : i32, i32
  }
}

</mosaic_0001>

<bundles_post_ra>
// kernel: cnn_forward.1
= control target key start
LH: loop header
LB: loop body
LE: loop exit
PB: predicated region body
PF: predicated region fallthrough
CT: control target
= control target key end

     0   :  { %vm63_vm0 = vcmask 64512   ;;  %s1375_s24 = smov 48   ;;  %s1376_s25 = smov 96   ;;  %vm52_vm1 = vcmask 517120   ;;  %v1382_v6 = vmov 0.0   ;;  %vm111_vm2 = vcmask 1047556   ;;  %s2265_s1 = inlined_call_operand.vmem [shape: f32[8,128], index: 1, kind: input, shape index: {}]   ;;  %s2266_s0 = inlined_call_operand.vmem [shape: f32[2,8], index: 0, kind: input, shape index: {}]   ;;  %s2267_s2 = inlined_call_operand.vmem [shape: f32[1,128], index: 2, kind: input, shape index: {}]   ;;  %s2268_s3 = inlined_call_operand.vmem [shape: f32[5,16,32], index: 3, kind: input, shape index: {}]   ;;  %s2269_s4 = inlined_call_operand.vmem [shape: f32[1,32], index: 4, kind: input, shape index: {}]   ;;  %s2270_s5 = inlined_call_operand.vmem [shape: f32[5,32,64], index: 5, kind: input, shape index: {}]   ;;  %s2271_s6 = inlined_call_operand.vmem [shape: f32[1,64], index: 6, kind: input, shape index: {}]   ;;  %s2272_s7 = inlined_call_operand.vmem [shape: f32[5,64,128], index: 7, kind: input, shape index: {}]   ;;  %s2273_s8 = inlined_call_operand.vmem [shape: f32[1,128], index: 8, kind: input, shape index: {}]   ;;  %s2274_s10 = inlined_call_operand.vmem [shape: f32[1,100], index: 10, kind: input, shape index: {}]   ;;  %s2275_s9 = inlined_call_operand.vmem [shape: f32[1024,100], index: 9, kind: input, shape index: {}]   ;;  %s2276_s12 = inlined_call_operand.vmem [shape: f32[1,64], index: 12, kind: input, shape index: {}]   ;;  %s2277_s11 = inlined_call_operand.vmem [shape: f32[100,64], index: 11, kind: input, shape index: {}]   ;;  %s2278_s13 = inlined_call_operand.vmem [shape: f32[64,1], index: 13, kind: input, shape index: {}]   ;;  %s2279_s14 = inlined_call_operand.<no memory space> [shape: f32[1,1], index: 14, kind: input, shape index: {}]   ;;  %s2280_s15 = inlined_call_operand.vmem [shape: f32[2,1], index: 15, kind: output, shape index: {}]  }
   0x1   :  { %v58_v0 = vld [vmem:[%s2265_s1] sm:$0xff]  ;;  %s1377_s26 = smov 80   ;;  %s1378_s1 = smov 32   ;;  %54 = vst.msk [vmem:[#allocation2 + $0x10] sm:$0x3] %vm52_vm1, %v1382_v6  ;;  %v1266_v7 = vld [vmem:[%s2268_s3 + $0x18] sm:$0xff] }
   0x2   :  { %v57_v1 = vld [vmem:[%s2266_s0] sm:$0x3]  ;;  %82 = vmatpush.msra.mxu0 %v58_v0  ;;  %s1379_s27 = smov 16   ;;  %s1380_s0 = smov 112   ;;  %53 = vst.msk [vmem:[#allocation2] sm:$0x3] %vm52_vm1, %v1382_v6  ;;  %1354 = vmatpush.msra.mxu3 %v1266_v7 }
   0x3   :  { %1264 = vmatmul.msk.f32.vlgmr.msra.gmra.mxu0 %vm63_vm0, %v57_v1  ;;  %v1368_v2 = vld [vmem:[%s2267_s2] ss:$0 sm:$0xff]  ;;  %s1381_s28 = smov 64   ;;  %v1265_v8 = vld [vmem:[%s2268_s3 + $0x10] sm:$0xff]  ;;  %v157_v9 = vld [vmem:[%s2268_s3 + $0x8] sm:$0xff]  ;;  %183 = vmatpush.msra.mxu1 %v1266_v7  ;;  %vm151_vm3 = vcmask 130048  }
   0x4   :  { %55 = vst.msk [vmem:[#allocation2 + $0xa] sm:$0x3] %vm52_vm1, %v1382_v6  ;;  %v1276_v10 = vld [vmem:[%s2268_s3 + $0x38] sm:$0xff]  ;;  %212 = vmatpush.msra.mxu2 %v157_v9  ;;  %1355 = vmatpush.msra.mxu3 %v1265_v8  ;;  %v1272_v13 = vld [vmem:[%s2268_s3 + $0x28] sm:$0xff]  ;;  %v156_v14 = vld [vmem:[%s2268_s3] sm:$0xff]  ;;  %vm337_vm4 = vcmask 261120  }
   0x5   :  { %56 = vst.msk [vmem:[#allocation2 + $0x1a] sm:$0x3] %vm52_vm1, %v1382_v6  ;;  %282 = vmatpush.msrb.mxu0 %v1276_v10  ;;  %184 = vmatpush.msra.mxu1 %v1265_v8  ;;  %v1275_v15 = vld [vmem:[%s2268_s3 + $0x30] sm:$0xff]  ;;  %v1271_v17 = vld [vmem:[%s2268_s3 + $0x20] sm:$0xff]  ;;  %v1280_v18 = vld [vmem:[%s2268_s3 + $0x48] sm:$0xff]  ;;  %vm533_vm5 = vcmask 523264  }
   0x6   :  { %246 = vmatpush.msrb.mxu3 %v1272_v13  ;;  %213 = vmatpush.msra.mxu2 %v156_v14  ;;  %v1383_v19 = vmov 1983009808   ;;  %v1279_v27 = vld [vmem:[%s2268_s3 + $0x40] sm:$0xff]  ;;  %v1384_v29 = vmov 1934713408   ;;  %v1286_v62 = vld [vmem:[%s2270_s5 + $0x38] sm:$0xff] }
   0x7   :  { %283 = vmatpush.msrb.mxu0 %v1275_v15  ;;  %v114_v20 = vunpack.c.l.s4 %v1383_v19  ;;  %318 = vmatpush.msrb.mxu1 %v1280_v18  ;;  %v138_v30 = vunpack.c.l.s4 %v1384_v29  ;;  %v345_v63 = vld [vmem:[%s2270_s5 + $0x18] sm:$0xff]  ;;  %v1284_v6 = vld [vmem:[%s2270_s5 + $0x28] sm:$0xff]  ;;  %v1297_v13 = vld [vmem:[%s2270_s5 + $0x60] sm:$0xff]  ;;  %vm754_vm6 = vcmask 1041409   ;;  %vm756_vm7 = vcmask 1043459  }
   0x8   :  { %1356 = vmatpush.msrb.mxu2 %v1276_v10  ;;  %247 = vmatpush.msrb.mxu3 %v1271_v17  ;;  %v1294_v0 = vld [vmem:[%s2270_s5 + $0x58] sm:$0xff]  ;;  %v343_v7 = vld [vmem:[%s2270_s5 + $0x8] sm:$0xff]  ;;  %v1283_v10 = vld [vmem:[%s2270_s5 + $0x20] sm:$0xff]  ;;  %vm758_vm8 = vcmask 1045509   ;;  %vm760_vm9 = vcmask 1047559   ;;  %vm1199_vm10 = vcmask 1043456  }
   0x9   :  { %v115_v24 = vunpack.c.0.s8 %v114_v20  ;;  %319 = vmatpush.msrb.mxu1 %v1279_v27  ;;  %v139_v37 = vunpack.c.0.s8 %v138_v30  ;;  %v1300_v1 = vld [vmem:[%s2270_s5 + $0x78] sm:$0xff]  ;;  %436 = vmatpush.msra.mxu0 %v1294_v0  ;;  %v1292_v8 = vld [vmem:[%s2270_s5 + $0x48] sm:$0xff]  ;;  %v1303_v20 = vld [vmem:[%s2270_s5 + $0x80] sm:$0xff]  ;;  %vm1195_vm11 = vcmask 818176   ;;  %vm1258_vm12 = vcmask 1024  }
   0xa   :  { %1357 = vmatpush.msrb.mxu2 %v1275_v15  ;;  %v1298_v9 = vld [vmem:[%s2270_s5 + $0x68] sm:$0xff]  ;;  %v1306_v14 = vld [vmem:[%s2270_s5 + $0x98] sm:$0xff]  ;;  %v1305_v15 = vld [vmem:[%s2270_s5 + $0x90] sm:$0xff] }
   0xb   :  { %v1304_v19 = vld [vmem:[%s2270_s5 + $0x88] sm:$0xff]  ;;  %v542_v0 = vld [vmem:[%s2272_s7 + $0x20] sm:$0xff] }
  0x80   :  { %v84_v3 = vpop.f32.mrf.mxu0 }
  0x81   :  { %v85_v4 = vadd.f32 %v1368_v2, %v84_v3  ;;  %v1285_v2 = vld [vmem:[%s2270_s5 + $0x30] sm:$0xff] }
  0x82   :  { %v344_v3 = vld [vmem:[%s2270_s5 + $0x10] sm:$0xff] }
  0x83   :  { %v87_v5 = vmax.f32 %v85_v4, 0.0  ;;  %v1293_v4 = vld [vmem:[%s2270_s5 + $0x50] sm:$0xff] }
  0x84   :  { %437 = vmatpush.msra.mxu0 %v1293_v4  ;;  %v541_v4 = vld [vmem:[%s2272_s7 + $0x18] sm:$0xff] }
  0x85   :  { %101 = vrot.lane.b32.xlu2 %v87_v5, %s1375_s24  ;;  %92 = vrot.lane.b32.xlu1 %v87_v5, %s1376_s25 }
  0x86   :  { %95 = vrot.lane.b32.xlu0 %v87_v5, %s1377_s26  ;;  %438 = vmatpush.msra.mxu0 %v1292_v8  ;;  %v540_v8 = vld [vmem:[%s2272_s7 + $0x10] sm:$0xff] }
  0x8d   :  { %104 = vrot.lane.b32.xlu2 %v87_v5, %s1378_s1  ;;  %107 = vrot.lane.b32.xlu1 %v87_v5, %s1379_s27 }
  0x8e   :  { %89 = vrot.lane.b32.xlu0 %v87_v5, %s1380_s0 }
  0x96   :  { %98 = vrot.lane.b32.xlu0 %v87_v5, %s1381_s28 }
  0xdf   :  { %v102_v16 = vpop.permute.xlu2 %101 }
  0xe7   :  { %v105_v34 = vpop.permute.xlu2 %104 }
  0xe8   :  { %v123_v40 = vrot.slane %v105_v34, 4 }
  0xf7   :  { %v93_v11 = vpop.permute.xlu1 %92 }
  0xf8   :  { %v96_v12 = vpop.permute.xlu0 %95  ;;  %v110_v21 = vrot.slane %v93_v11, 4  ;;  %v342_v11 = vld [vmem:[%s2270_s5] sm:$0xff] }
  0xf9   :  { %v117_v22 = vrot.slane %v96_v12, 4  ;;  %v1291_v12 = vld [vmem:[%s2270_s5 + $0x40] sm:$0xff] }
  0xfa   :  { %v112_v28 = vsel %vm111_vm2, %v110_v21, %v87_v5  ;;  %v1299_v5 = vld [vmem:[%s2270_s5 + $0x70] sm:$0xff]  ;;  %439 = vmatpush.msra.mxu0 %v1291_v12  ;;  %v539_v12 = vld [vmem:[%s2272_s7 + $0x8] sm:$0xff] }
  0xfb   :  { %v116_v35 = vperm.slane %v112_v28, %v115_v24  ;;  %v1369_v28 = vld [vmem:[%s2269_s4] ss:$0 sm:$0xff] }
  0xff   :  { %v108_v23 = vpop.permute.xlu1 %107 }
 0x100   :  { %v129_v25 = vrot.slane %v108_v23, 4  ;;  %v90_v26 = vpop.permute.xlu0 %89 }
 0x101   :  { %v118_v31 = vsel %vm111_vm2, %v117_v22, %v90_v26 }
 0x102   :  { %v122_v32 = vperm.slane %v118_v31, %v115_v24  ;;  %v130_v33 = vsel %vm111_vm2, %v129_v25, %v102_v16 }
 0x103   :  { %v134_v38 = vperm.slane %v130_v33, %v115_v24 }
 0x104   :  { %v135_v36 = vrot.slane %v122_v32, 4 }
 0x105   :  { %v141_v44 = vrot.slane %v134_v38, 4 }
 0x106   :  { %v136_v39 = vsel %vm111_vm2, %v135_v36, %v116_v35 }
 0x107   :  { %v140_v42 = vperm.slane %v136_v39, %v139_v37 }
 0x108   :  { %v99_v41 = vpop.permute.xlu0 %98 }
 0x109   :  { %v124_v43 = vsel %vm111_vm2, %v123_v40, %v99_v41  ;;  %v149_v47 = vrot.slane %v140_v42, 4 }
 0x10a   :  { %v128_v45 = vperm.slane %v124_v43, %v115_v24 }
 0x10c   :  { %v142_v46 = vsel %vm111_vm2, %v141_v44, %v128_v45 }
 0x10d   :  { %v146_v48 = vperm.slane %v142_v46, %v139_v37 }
 0x10f   :  { %v147_v49 = vrot.slane %v146_v48, 4  ;;  %v150_v50 = vsel %vm111_vm2, %v146_v48, %v149_v47 }
 0x110   :  { %153 = vst.msk [vmem:[#allocation2 + $0x12] sm:$0xff] %vm151_vm3, %v150_v50 }
 0x111   :  { %v148_v51 = vsel %vm111_vm2, %v147_v49, %v140_v42 }
 0x112   :  { %152 = vst.msk [vmem:[#allocation2 + $0x2] sm:$0xff] %vm151_vm3, %v148_v51  ;;  %v1316_v51 = vld [vmem:[%s2272_s7 + $0x78] sm:$0xff] }
 0x117   :  { %v159_v52 = vld [vmem:[#allocation2 + $0x11] sm:$0xff] }
 0x118   :  { %1268 = vmatmul.msk.f32.vlgmr.msra.gmra.mxu3 %vm151_vm3, %v159_v52  ;;  %v155_v57 = vld [vmem:[#allocation2 + $0x10] sm:$0xff] }
 0x119   :  { %v158_v53 = vld [vmem:[#allocation2 + $0x1] sm:$0xff]  ;;  %v222_v59 = vld [vmem:[#allocation2 + $0x12] sm:$0xff]  ;;  %400 = vmatpush.msra.mxu3 %v345_v63 }
 0x11a   :  { %v154_v54 = vld [vmem:[#allocation2] sm:$0xff]  ;;  %1267 = vmatmul.msk.f32.vlgmr.msra.gmra.mxu1 %vm151_vm3, %v158_v53  ;;  %v258_v60 = vld [vmem:[#allocation2 + $0x13] sm:$0xff] }
 0x11b   :  { %v257_v55 = vld [vmem:[#allocation2 + $0x3] sm:$0xff]  ;;  %1269 = vmatmul.msk.f32.vlgmr.msra.gmra.mxu2 %vm151_vm3, %v154_v54  ;;  %v294_v61 = vld [vmem:[#allocation2 + $0x14] sm:$0xff]  ;;  %474 = vmatpush.msra.mxu1 %v1300_v1 }
 0x11c   :  { %1277 = vmatmul.msk.f32.vlgmr.msrb.gmra.mxu0 %vm151_vm3, %v257_v55  ;;  %v221_v56 = vld [vmem:[#allocation2 + $0x2] sm:$0xff]  ;;  %371 = vmatpush.msra.mxu2 %v1286_v62  ;;  %v545_v52 = vld [vmem:[%s2272_s7 + $0x38] sm:$0xff]  ;;  %v1313_v63 = vld [vmem:[%s2272_s7 + $0x60] sm:$0xff] }
 0x11d   :  { %v293_v58 = vld [vmem:[#allocation2 + $0x4] sm:$0xff]  ;;  %401 = vmatpush.msra.mxu3 %v344_v3  ;;  %475 = vmatpush.msra.mxu1 %v1299_v5  ;;  %v1328_v53 = vld [vmem:[%s2272_s7 + $0xb8] sm:$0xff]  ;;  %v1325_v1 = vld [vmem:[%s2272_s7 + $0xa0] sm:$0xff] }
 0x11e   :  { %372 = vmatpush.msra.mxu2 %v1285_v2  ;;  %v1338_v54 = vld [vmem:[%s2272_s7 + $0xf8] sm:$0xff]  ;;  %600 = vmatpush.msrb.mxu0 %v545_v52  ;;  %v1315_v55 = vld [vmem:[%s2272_s7 + $0x70] sm:$0xff]  ;;  %v1336_v62 = vld [vmem:[%s2272_s7 + $0xe8] sm:$0xff] }
 0x11f   :  { %402 = vmatpush.msra.mxu3 %v343_v7  ;;  %476 = vmatpush.msra.mxu1 %v1298_v9  ;;  %v1335_v2 = vld [vmem:[%s2272_s7 + $0xe0] sm:$0xff]  ;;  %v1312_v3 = vld [vmem:[%s2272_s7 + $0x58] sm:$0xff]  ;;  %v1311_v7 = vld [vmem:[%s2272_s7 + $0x50] sm:$0xff] }
 0x120   :  { %1273 = vmatmul.msk.f32.vlgmr.msrb.gmra.mxu3 %vm151_vm3, %v221_v56  ;;  %373 = vmatpush.msra.mxu2 %v1284_v6  ;;  %v544_v56 = vld [vmem:[%s2272_s7 + $0x30] sm:$0xff]  ;;  %v1324_v5 = vld [vmem:[%s2272_s7 + $0x98] sm:$0xff] }
 0x121   :  { %403 = vmatpush.msra.mxu3 %v342_v11  ;;  %477 = vmatpush.msra.mxu1 %v1297_v13  ;;  %v1334_v6 = vld [vmem:[%s2272_s7 + $0xd8] sm:$0xff]  ;;  %v1323_v9 = vld [vmem:[%s2272_s7 + $0x90] sm:$0xff]  ;;  %v1310_v11 = vld [vmem:[%s2272_s7 + $0x48] sm:$0xff] }
 0x122   :  { %1281 = vmatmul.msk.f32.vlgmr.msrb.gmra.mxu1 %vm151_vm3, %v293_v58  ;;  %374 = vmatpush.msra.mxu2 %v1283_v10  ;;  %v1337_v58 = vld [vmem:[%s2272_s7 + $0xf0] sm:$0xff]  ;;  %v1322_v13 = vld [vmem:[%s2272_s7 + $0x88] sm:$0xff] }
 0x123   :  { %1270 = vmatmul.msk.f32.gmra.mxu2 %vm151_vm3, %v155_v57  ;;  %571 = vmatpush.msrb.mxu3 %v1316_v51  ;;  %v1327_v57 = vld [vmem:[%s2272_s7 + $0xb0] sm:$0xff] }
 0x124   :  { %640 = vmatpush.msrb.mxu1 %v1328_v53  ;;  %601 = vmatpush.msrb.mxu0 %v544_v56  ;;  %v1333_v10 = vld [vmem:[%s2272_s7 + $0xd0] sm:$0xff] }
 0x125   :  { %572 = vmatpush.msrb.mxu3 %v1315_v55 }
 0x126   :  { %641 = vmatpush.msrb.mxu1 %v1327_v57 }
 0x128   :  { %1274 = vmatmul.msk.f32.gmra.mxu3 %vm151_vm3, %v222_v59  ;;  %v1314_v59 = vld [vmem:[%s2272_s7 + $0x68] sm:$0xff] }
 0x129   :  { %573 = vmatpush.msrb.mxu3 %v1314_v59 }
 0x12a   :  { %1282 = vmatmul.msk.f32.gmra.mxu1 %vm151_vm3, %v294_v61  ;;  %v1326_v61 = vld [vmem:[%s2272_s7 + $0xa8] sm:$0xff] }
 0x12b   :  { %1278 = vmatmul.msk.f32.vlgmr.msrb.gmra.mxu2 %vm151_vm3, %v258_v60  ;;  %v543_v60 = vld [vmem:[%s2272_s7 + $0x28] sm:$0xff]  ;;  %642 = vmatpush.msrb.mxu1 %v1326_v61  ;;  %v880_v61 = vld [vmem:[%s2275_s9 + $0x78] sm:$0xff] }
 0x12c   :  { %512 = vmatpush.msrb.mxu2 %v1306_v14  ;;  %602 = vmatpush.msrb.mxu0 %v543_v60  ;;  %v1332_v14 = vld [vmem:[%s2272_s7 + $0xc8] sm:$0xff] }
 0x12d   :  { %574 = vmatpush.msrb.mxu3 %v1313_v63  ;;  %643 = vmatpush.msrb.mxu1 %v1325_v1  ;;  %v912_v63 = vld [vmem:[%s2275_s9 + $0x178] sm:$0xff] }
 0x12e   :  { %513 = vmatpush.msrb.mxu2 %v1305_v15  ;;  %603 = vmatpush.msrb.mxu0 %v542_v0  ;;  %v1309_v15 = vld [vmem:[%s2272_s7 + $0x40] sm:$0xff]  ;;  %v928_v1 = vld [vmem:[%s2275_s9 + $0x1f8] sm:$0xff] }
 0x12f   :  { %575 = vmatpush.msrb.mxu3 %v1312_v3  ;;  %644 = vmatpush.msrb.mxu1 %v1324_v5  ;;  %v895_v3 = vld [vmem:[%s2275_s9 + $0xf0] sm:$0xff] }
 0x130   :  { %514 = vmatpush.msrb.mxu2 %v1304_v19  ;;  %604 = vmatpush.msrb.mxu0 %v541_v4  ;;  %v911_v4 = vld [vmem:[%s2275_s9 + $0x170] sm:$0xff] }
 0x131   :  { %576 = vmatpush.msrb.mxu3 %v1311_v7  ;;  %645 = vmatpush.msrb.mxu1 %v1323_v9  ;;  %v927_v5 = vld [vmem:[%s2275_s9 + $0x1f0] sm:$0xff]  ;;  %v878_v7 = vld [vmem:[%s2275_s9 + $0x68] sm:$0xff] }
 0x132   :  { %515 = vmatpush.msrb.mxu2 %v1303_v20  ;;  %605 = vmatpush.msrb.mxu0 %v540_v8  ;;  %v1348_v20 = vld [vmem:[%s2272_s7 + $0x138] sm:$0xff]  ;;  %v894_v8 = vld [vmem:[%s2275_s9 + $0xe8] sm:$0xff] }
 0x133   :  { %577 = vmatpush.msrb.mxu3 %v1310_v11  ;;  %646 = vmatpush.msrb.mxu1 %v1322_v13  ;;  %v910_v9 = vld [vmem:[%s2275_s9 + $0x168] sm:$0xff]  ;;  %v877_v13 = vld [vmem:[%s2275_s9 + $0x60] sm:$0xff] }
 0x134   :  { %606 = vmatpush.msrb.mxu0 %v539_v12  ;;  %v926_v12 = vld [vmem:[%s2275_s9 + $0x1e8] sm:$0xff] }
 0x135   :  { %578 = vmatpush.msrb.mxu3 %v1309_v15  ;;  %v909_v15 = vld [vmem:[%s2275_s9 + $0x160] sm:$0xff] }
 0x197   :  { %v186_v16 = vpop.f32.mrf.mxu1 }
 0x199   :  { %v285_v23 = vpop.f32.mrf.mxu0 }
 0x19b   :  { %v189_v17 = vpop.f32.mrf.mxu3 }
 0x19e   :  { %v215_v18 = vpop.f32.mrf.mxu2 }
 0x19f   :  { %v216_v21 = vadd.f32 %v215_v18, %v186_v16  ;;  %v321_v25 = vpop.f32.mrf.mxu1  ;;  %v538_v16 = vld [vmem:[%s2272_s7] sm:$0xff] }
 0x1a0   :  { %v1331_v18 = vld [vmem:[%s2272_s7 + $0xc0] sm:$0xff]  ;;  %607 = vmatpush.msrb.mxu0 %v538_v16 }
 0x1a1   :  { %v925_v16 = vld [vmem:[%s2275_s9 + $0x1e0] sm:$0xff] }
 0x1a3   :  { %v249_v22 = vpop.f32.mrf.mxu3 }
 0x1a4   :  { %v255_v24 = vadd.f32 %v249_v22, %v216_v21  ;;  %v1347_v21 = vld [vmem:[%s2272_s7 + $0x130] sm:$0xff] }
 0x1a6   :  { %v218_v26 = vpop.f32.mrf.mxu2  ;;  %v291_v27 = vadd.f32 %v285_v23, %v255_v24  ;;  %v1346_v23 = vld [vmem:[%s2272_s7 + $0x128] sm:$0xff]  ;;  %v1345_v24 = vld [vmem:[%s2272_s7 + $0x120] sm:$0xff] }
 0x1a7   :  { %v219_v31 = vadd.f32 %v218_v26, %v189_v17  ;;  %v324_v37 = vpop.f32.mrf.mxu1  ;;  %v1321_v17 = vld [vmem:[%s2272_s7 + $0x80] sm:$0xff] }
 0x1a8   :  { %v327_v29 = vadd.f32 %v321_v25, %v291_v27  ;;  %647 = vmatpush.msrb.mxu1 %v1321_v17 }
 0x1aa   :  { %v333_v30 = vadd.f32 %v1369_v28, %v327_v29  ;;  %v1343_v29 = vld [vmem:[%s2272_s7 + $0x110] sm:$0xff] }
 0x1ab   :  { %v252_v32 = vpop.f32.mrf.mxu3 }
 0x1ac   :  { %v335_v33 = vmax.f32 %v333_v30, 0.0  ;;  %v256_v34 = vadd.f32 %v252_v32, %v219_v31  ;;  %v1342_v30 = vld [vmem:[%s2272_s7 + $0x108] sm:$0xff] }
 0x1ae   :  { %v288_v35 = vpop.f32.mrf.mxu2  ;;  %338 = vst.msk [vmem:[#allocation2 + $0x2] sm:$0xff] %vm337_vm4, %v335_v33 }
 0x1af   :  { %v292_v36 = vadd.f32 %v288_v35, %v256_v34  ;;  %v1341_v34 = vld [vmem:[%s2272_s7 + $0x100] sm:$0xff] }
 0x1b1   :  { %v328_v38 = vadd.f32 %v324_v37, %v292_v36  ;;  %v1370_v37 = vld [vmem:[%s2271_s6] ss:$0 sm:$0xff] }
 0x1b3   :  { %v334_v39 = vadd.f32 %v1369_v28, %v328_v38  ;;  %v1344_v28 = vld [vmem:[%s2272_s7 + $0x118] sm:$0xff] }
 0x1b5   :  { %v336_v40 = vmax.f32 %v334_v39, 0.0  ;;  %v346_v41 = vld [vmem:[#allocation2 + $0x1] sm:$0xff] }
 0x1b6   :  { %v340_v42 = vld [vmem:[#allocation2] sm:$0xff]  ;;  %1287 = vmatmul.msk.f32.vlgmr.msra.gmra.mxu2 %vm337_vm4, %v346_v41 }
 0x1b7   :  { %v411_v43 = vld [vmem:[#allocation2 + $0x2] sm:$0xff]  ;;  %339 = vst.msk [vmem:[#allocation2 + $0x12] sm:$0xff] %vm337_vm4, %v336_v40  ;;  %1289 = vmatmul.msk.f32.vlgmr.msra.gmra.mxu3 %vm337_vm4, %v340_v42  ;;  %682 = vmatpush.msra.mxu2 %v1338_v54 }
 0x1b8   :  { %v449_v44 = vld [vmem:[#allocation2 + $0x3] sm:$0xff]  ;;  %1295 = vmatmul.msk.f32.vlgmr.msra.gmra.mxu0 %vm337_vm4, %v411_v43  ;;  %724 = vmatpush.msra.mxu3 %v1348_v20  ;;  %v908_v20 = vld [vmem:[%s2275_s9 + $0x158] sm:$0xff] }
 0x1b9   :  { %1301 = vmatmul.msk.f32.vlgmr.msra.gmra.mxu1 %vm337_vm4, %v449_v44  ;;  %v487_v49 = vld [vmem:[#allocation2 + $0x4] sm:$0xff]  ;;  %683 = vmatpush.msra.mxu2 %v1337_v58 }
 0x1ba   :  { %725 = vmatpush.msra.mxu3 %v1347_v21  ;;  %1018 = vmatpush.msra.mxu0 %v880_v61  ;;  %v885_v61 = vld [vmem:[%s2275_s9 + $0xa0] sm:$0xff] }
 0x1bb   :  { %684 = vmatpush.msra.mxu2 %v1336_v62  ;;  %v896_v62 = vld [vmem:[%s2275_s9 + $0xf8] sm:$0xff] }
 0x1bc   :  { %726 = vmatpush.msra.mxu3 %v1346_v23  ;;  %1038 = vmatpush.msra.mxu1 %v896_v62  ;;  %v875_v23 = vld [vmem:[%s2275_s9 + $0x50] sm:$0xff]  ;;  %v901_v62 = vld [vmem:[%s2275_s9 + $0x120] sm:$0xff] }
 0x1bd   :  { %685 = vmatpush.msra.mxu2 %v1335_v2  ;;  %v879_v2 = vld [vmem:[%s2275_s9 + $0x70] sm:$0xff] }
 0x1be   :  { %v347_v45 = vld [vmem:[#allocation2 + $0x11] sm:$0xff]  ;;  %727 = vmatpush.msra.mxu3 %v1345_v24  ;;  %1019 = vmatpush.msra.mxu0 %v879_v2  ;;  %v891_v24 = vld [vmem:[%s2275_s9 + $0xd0] sm:$0xff] }
 0x1bf   :  { %v341_v46 = vld [vmem:[#allocation2 + $0x10] sm:$0xff]  ;;  %1288 = vmatmul.msk.f32.gmra.mxu2 %vm337_vm4, %v347_v45  ;;  %1039 = vmatpush.msra.mxu1 %v895_v3 }
 0x1c0   :  { %v412_v47 = vld [vmem:[#allocation2 + $0x12] sm:$0xff]  ;;  %1290 = vmatmul.msk.f32.gmra.mxu3 %vm337_vm4, %v341_v46  ;;  %686 = vmatpush.msra.mxu2 %v1334_v6 }
 0x1c1   :  { %v450_v48 = vld [vmem:[#allocation2 + $0x13] sm:$0xff]  ;;  %1296 = vmatmul.msk.f32.gmra.mxu0 %vm337_vm4, %v412_v47  ;;  %728 = vmatpush.msra.mxu3 %v1344_v28  ;;  %v923_v28 = vld [vmem:[%s2275_s9 + $0x1d0] sm:$0xff] }
 0x1c2   :  { %1302 = vmatmul.msk.f32.gmra.mxu1 %vm337_vm4, %v450_v48  ;;  %v488_v50 = vld [vmem:[#allocation2 + $0x14] sm:$0xff]  ;;  %687 = vmatpush.msra.mxu2 %v1333_v10 }
 0x1c3   :  { %729 = vmatpush.msra.mxu3 %v1343_v29  ;;  %1020 = vmatpush.msra.mxu0 %v878_v7  ;;  %v868_v2 = vld [vmem:[%s2275_s9 + $0x18] sm:$0xff] }
 0x1c4   :  { %688 = vmatpush.msra.mxu2 %v1332_v14  ;;  %1040 = vmatpush.msra.mxu1 %v894_v8  ;;  %v893_v14 = vld [vmem:[%s2275_s9 + $0xe0] sm:$0xff]  ;;  %v884_v3 = vld [vmem:[%s2275_s9 + $0x98] sm:$0xff] }
 0x1c5   :  { %730 = vmatpush.msra.mxu3 %v1342_v30  ;;  %1021 = vmatpush.msra.mxu0 %v877_v13  ;;  %v915_v13 = vld [vmem:[%s2275_s9 + $0x190] sm:$0xff] }
 0x1c6   :  { %689 = vmatpush.msra.mxu2 %v1331_v18  ;;  %1041 = vmatpush.msra.mxu1 %v893_v14  ;;  %v876_v18 = vld [vmem:[%s2275_s9 + $0x58] sm:$0xff] }
 0x1c7   :  { %1307 = vmatmul.msk.f32.vlgmr.msrb.gmra.mxu2 %vm337_vm4, %v487_v49  ;;  %731 = vmatpush.msra.mxu3 %v1341_v34 }
 0x1c8   :  { %1058 = vmatpush.msrb.mxu2 %v912_v63  ;;  %1022 = vmatpush.msra.mxu0 %v876_v18  ;;  %v917_v63 = vld [vmem:[%s2275_s9 + $0x1a0] sm:$0xff]  ;;  %v898_v18 = vld [vmem:[%s2275_s9 + $0x108] sm:$0xff] }
 0x1ca   :  { %1059 = vmatpush.msrb.mxu2 %v911_v4  ;;  %1023 = vmatpush.msra.mxu0 %v875_v23  ;;  %v900_v4 = vld [vmem:[%s2275_s9 + $0x118] sm:$0xff]  ;;  %v881_v23 = vld [vmem:[%s2275_s9 + $0x80] sm:$0xff] }
 0x1cc   :  { %1060 = vmatpush.msrb.mxu2 %v910_v9  ;;  %v867_v9 = vld [vmem:[%s2275_s9 + $0x10] sm:$0xff] }
 0x1ce   :  { %1061 = vmatpush.msrb.mxu2 %v909_v15 }
 0x1cf   :  { %1308 = vmatmul.msk.f32.gmra.mxu2 %vm337_vm4, %v488_v50 }
 0x1d0   :  { %1062 = vmatpush.msrb.mxu2 %v908_v20 }
 0x235   :  { %v441_v26 = vpop.f32.mrf.mxu0 }
 0x236   :  { %v479_v32 = vpop.f32.mrf.mxu1 }
 0x239   :  { %v376_v19 = vpop.f32.mrf.mxu2 }
 0x23a   :  { %v405_v22 = vpop.f32.mrf.mxu3 }
 0x23b   :  { %v406_v25 = vadd.f32 %v405_v22, %v376_v19  ;;  %v892_v19 = vld [vmem:[%s2275_s9 + $0xd8] sm:$0xff] }
 0x23c   :  { %1042 = vmatpush.msra.mxu1 %v892_v19  ;;  %v924_v22 = vld [vmem:[%s2275_s9 + $0x1d8] sm:$0xff] }
 0x23d   :  { %v447_v31 = vadd.f32 %v441_v26, %v406_v25  ;;  %v907_v25 = vld [vmem:[%s2275_s9 + $0x150] sm:$0xff] }
 0x23e   :  { %v444_v40 = vpop.f32.mrf.mxu0  ;;  %1043 = vmatpush.msra.mxu1 %v891_v24  ;;  %1063 = vmatpush.msrb.mxu2 %v907_v25  ;;  %v897_v24 = vld [vmem:[%s2275_s9 + $0x100] sm:$0xff] }
 0x23f   :  { %v485_v36 = vadd.f32 %v479_v32, %v447_v31  ;;  %v482_v44 = vpop.f32.mrf.mxu1  ;;  %v874_v31 = vld [vmem:[%s2275_s9 + $0x48] sm:$0xff] }
 0x240   :  { %v890_v32 = vld [vmem:[%s2275_s9 + $0xc8] sm:$0xff]  ;;  %1024 = vmatpush.msra.mxu0 %v874_v31  ;;  %v992_v31 = vld [vmem:[%s2275_s9 + $0x3f8] sm:$0xff] }
 0x241   :  { %1044 = vmatpush.msra.mxu1 %v890_v32 }
 0x242   :  { %v379_v27 = vpop.f32.mrf.mxu2 }
 0x243   :  { %v408_v33 = vpop.f32.mrf.mxu3 }
 0x244   :  { %v409_v35 = vadd.f32 %v408_v33, %v379_v27  ;;  %v1806_v27 = vld [vmem:[%s2273_s8] ss:$0 sm:$0xff]  ;;  %v906_v33 = vld [vmem:[%s2275_s9 + $0x148] sm:$0xff] }
 0x245   :  { %1064 = vmatpush.msrb.mxu2 %v906_v33  ;;  %v943_v33 = vld [vmem:[%s2275_s9 + $0x270] sm:$0xff] }
 0x246   :  { %v448_v41 = vadd.f32 %v444_v40, %v409_v35  ;;  %v922_v35 = vld [vmem:[%s2275_s9 + $0x1c8] sm:$0xff] }
 0x248   :  { %v486_v45 = vadd.f32 %v482_v44, %v448_v41  ;;  %v921_v41 = vld [vmem:[%s2275_s9 + $0x1c0] sm:$0xff]  ;;  %v872_v44 = vld [vmem:[%s2275_s9 + $0x38] sm:$0xff] }
 0x24a   :  { %v517_v38 = vpop.f32.mrf.mxu2 }
 0x24b   :  { %v523_v39 = vadd.f32 %v517_v38, %v485_v36  ;;  %v889_v38 = vld [vmem:[%s2275_s9 + $0xc0] sm:$0xff] }
 0x24c   :  { %1045 = vmatpush.msra.mxu1 %v889_v38 }
 0x24d   :  { %v529_v42 = vadd.f32 %v1370_v37, %v523_v39  ;;  %v905_v39 = vld [vmem:[%s2275_s9 + $0x140] sm:$0xff] }
 0x24e   :  { %1065 = vmatpush.msrb.mxu2 %v905_v39  ;;  %v942_v39 = vld [vmem:[%s2275_s9 + $0x268] sm:$0xff] }
 0x24f   :  { %v531_v43 = vmax.f32 %v529_v42, 0.0 }
 0x251   :  { %534 = vst.msk [vmem:[#allocation2 + $0x2] sm:$0xff] %vm533_vm5, %v531_v43 }
 0x252   :  { %v520_v46 = vpop.f32.mrf.mxu2 }
 0x253   :  { %v524_v47 = vadd.f32 %v520_v46, %v486_v45  ;;  %v888_v45 = vld [vmem:[%s2275_s9 + $0xb8] sm:$0xff] }
 0x254   :  { %v904_v46 = vld [vmem:[%s2275_s9 + $0x138] sm:$0xff]  ;;  %1046 = vmatpush.msra.mxu1 %v888_v45  ;;  %v941_v45 = vld [vmem:[%s2275_s9 + $0x260] sm:$0xff] }
 0x255   :  { %v530_v48 = vadd.f32 %v1370_v37, %v524_v47  ;;  %v873_v37 = vld [vmem:[%s2275_s9 + $0x40] sm:$0xff]  ;;  %v920_v47 = vld [vmem:[%s2275_s9 + $0x1b8] sm:$0xff]  ;;  %1066 = vmatpush.msrb.mxu2 %v904_v46 }
 0x256   :  { %1025 = vmatpush.msra.mxu0 %v873_v37  ;;  %v991_v37 = vld [vmem:[%s2275_s9 + $0x3f0] sm:$0xff]  ;;  %v957_v46 = vld [vmem:[%s2275_s9 + $0x2e0] sm:$0xff] }
 0x257   :  { %v532_v49 = vmax.f32 %v530_v48, 0.0  ;;  %v871_v48 = vld [vmem:[%s2275_s9 + $0x30] sm:$0xff] }
 0x258   :  { %v546_v50 = vld [vmem:[#allocation2 + $0x1] sm:$0xff]  ;;  %1026 = vmatpush.msra.mxu0 %v872_v44 }
 0x259   :  { %v536_v51 = vld [vmem:[#allocation2] sm:$0xff]  ;;  %1317 = vmatmul.msk.f32.vlgmr.msrb.gmra.mxu3 %vm533_vm5, %v546_v50  ;;  %535 = vst.msk [vmem:[#allocation2 + $0x12] sm:$0xff] %vm533_vm5, %v532_v49  ;;  %v887_v49 = vld [vmem:[%s2275_s9 + $0xb0] sm:$0xff] }
 0x25a   :  { %v615_v52 = vld [vmem:[#allocation2 + $0x2] sm:$0xff]  ;;  %1319 = vmatmul.msk.f32.vlgmr.msrb.gmra.mxu0 %vm533_vm5, %v536_v51  ;;  %1078 = vmatpush.msrb.mxu3 %v928_v1 }
 0x25b   :  { %v657_v53 = vld [vmem:[#allocation2 + $0x3] sm:$0xff]  ;;  %1329 = vmatmul.msk.f32.vlgmr.msrb.gmra.mxu1 %vm533_vm5, %v615_v52  ;;  %1027 = vmatpush.msra.mxu0 %v871_v48  ;;  %v973_v48 = vld [vmem:[%s2275_s9 + $0x360] sm:$0xff] }
 0x25c   :  { %1339 = vmatmul.msk.f32.vlgmr.msra.gmra.mxu2 %vm533_vm5, %v657_v53  ;;  %v699_v58 = vld [vmem:[#allocation2 + $0x4] sm:$0xff]  ;;  %1079 = vmatpush.msrb.mxu3 %v927_v5 }
 0x25d   :  { %1047 = vmatpush.msra.mxu1 %v887_v49  ;;  %v903_v51 = vld [vmem:[%s2275_s9 + $0x130] sm:$0xff]  ;;  %v990_v44 = vld [vmem:[%s2275_s9 + $0x3e8] sm:$0xff]  ;;  %v989_v49 = vld [vmem:[%s2275_s9 + $0x3e0] sm:$0xff] }
 0x25e   :  { %1080 = vmatpush.msrb.mxu3 %v926_v12  ;;  %v919_v52 = vld [vmem:[%s2275_s9 + $0x1b0] sm:$0xff]  ;;  %1067 = vmatpush.msrb.mxu2 %v903_v51 }
 0x25f   :  { %v899_v12 = vld [vmem:[%s2275_s9 + $0x110] sm:$0xff] }
 0x260   :  { %v547_v54 = vld [vmem:[#allocation2 + $0x11] sm:$0xff]  ;;  %1081 = vmatpush.msrb.mxu3 %v925_v16  ;;  %v866_v16 = vld [vmem:[%s2275_s9 + $0x8] sm:$0xff] }
 0x261   :  { %v537_v55 = vld [vmem:[#allocation2 + $0x10] sm:$0xff]  ;;  %1318 = vmatmul.msk.f32.gmra.mxu3 %vm533_vm5, %v547_v54  ;;  %v870_v54 = vld [vmem:[%s2275_s9 + $0x28] sm:$0xff] }
 0x262   :  { %v616_v56 = vld [vmem:[#allocation2 + $0x12] sm:$0xff]  ;;  %1320 = vmatmul.msk.f32.gmra.mxu0 %vm533_vm5, %v537_v55  ;;  %1082 = vmatpush.msrb.mxu3 %v924_v22  ;;  %v886_v55 = vld [vmem:[%s2275_s9 + $0xa8] sm:$0xff] }
 0x263   :  { %v658_v57 = vld [vmem:[#allocation2 + $0x13] sm:$0xff]  ;;  %1330 = vmatmul.msk.f32.gmra.mxu1 %vm533_vm5, %v616_v56  ;;  %v902_v56 = vld [vmem:[%s2275_s9 + $0x128] sm:$0xff]  ;;  %1028 = vmatpush.msra.mxu0 %v870_v54 }
 0x264   :  { %1340 = vmatmul.msk.f32.gmra.mxu2 %vm533_vm5, %v658_v57  ;;  %v700_v59 = vld [vmem:[#allocation2 + $0x14] sm:$0xff]  ;;  %1083 = vmatpush.msrb.mxu3 %v923_v28 }
 0x265   :  { %1048 = vmatpush.msra.mxu1 %v886_v55  ;;  %1068 = vmatpush.msrb.mxu2 %v902_v56  ;;  %v865_v22 = vld [vmem:[%s2275_s9] sm:$0xff]  ;;  %v960_v28 = vld [vmem:[%s2275_s9 + $0x2f8] sm:$0xff] }
 0x266   :  { %1084 = vmatpush.msrb.mxu3 %v922_v35  ;;  %v988_v54 = vld [vmem:[%s2275_s9 + $0x3d8] sm:$0xff] }
 0x267   :  { %1049 = vmatpush.msra.mxu1 %v885_v61  ;;  %1069 = vmatpush.msrb.mxu2 %v901_v62  ;;  %v987_v61 = vld [vmem:[%s2275_s9 + $0x3d0] sm:$0xff]  ;;  %v938_v62 = vld [vmem:[%s2275_s9 + $0x248] sm:$0xff] }
 0x268   :  { %1085 = vmatpush.msrb.mxu3 %v921_v41  ;;  %v974_v41 = vld [vmem:[%s2275_s9 + $0x368] sm:$0xff] }
 0x269   :  { %1349 = vmatmul.msk.f32.vlgmr.msra.gmra.mxu3 %vm533_vm5, %v699_v58  ;;  %v918_v58 = vld [vmem:[%s2275_s9 + $0x1a8] sm:$0xff]  ;;  %1050 = vmatpush.msra.mxu1 %v884_v3 }
 0x26a   :  { %1086 = vmatpush.msrb.mxu3 %v920_v47  ;;  %1070 = vmatpush.msrb.mxu2 %v900_v4  ;;  %v970_v3 = vld [vmem:[%s2275_s9 + $0x348] sm:$0xff] }
 0x26b   :  { %v986_v4 = vld [vmem:[%s2275_s9 + $0x3c8] sm:$0xff] }
 0x26c   :  { %1087 = vmatpush.msrb.mxu3 %v919_v52  ;;  %1071 = vmatpush.msrb.mxu2 %v899_v12  ;;  %v956_v52 = vld [vmem:[%s2275_s9 + $0x2d8] sm:$0xff] }
 0x26d   :  { %v936_v12 = vld [vmem:[%s2275_s9 + $0x238] sm:$0xff] }
 0x26e   :  { %1088 = vmatpush.msrb.mxu3 %v918_v58  ;;  %1072 = vmatpush.msrb.mxu2 %v898_v18  ;;  %v955_v58 = vld [vmem:[%s2275_s9 + $0x2d0] sm:$0xff] }
 0x270   :  { %1089 = vmatpush.msrb.mxu3 %v917_v63  ;;  %1073 = vmatpush.msrb.mxu2 %v897_v24  ;;  %v982_v24 = vld [vmem:[%s2275_s9 + $0x3a8] sm:$0xff] }
 0x271   :  { %1350 = vmatmul.msk.f32.gmra.mxu3 %vm533_vm5, %v700_v59 }
 0x2d7   :  { %v609_v0 = vpop.f32.mrf.mxu0 }
 0x2d8   :  { %v649_v10 = vpop.f32.mrf.mxu1 }
 0x2dc   :  { %v580_v60 = vpop.f32.mrf.mxu3 }
 0x2dd   :  { %v610_v6 = vadd.f32 %v609_v0, %v580_v60  ;;  %v869_v60 = vld [vmem:[%s2275_s9 + $0x20] sm:$0xff] }
 0x2de   :  { %1029 = vmatpush.msra.mxu0 %v869_v60 }
 0x2df   :  { %v655_v17 = vadd.f32 %v649_v10, %v610_v6  ;;  %v691_v21 = vpop.f32.mrf.mxu2  ;;  %v612_v26 = vpop.f32.mrf.mxu0  ;;  %v916_v6 = vld [vmem:[%s2275_s9 + $0x198] sm:$0xff]  ;;  %v883_v10 = vld [vmem:[%s2275_s9 + $0x90] sm:$0xff] }
 0x2e0   :  { %v652_v40 = vpop.f32.mrf.mxu1  ;;  %1030 = vmatpush.msra.mxu0 %v868_v2  ;;  %1090 = vmatpush.msrb.mxu3 %v916_v6  ;;  %v937_v6 = vld [vmem:[%s2275_s9 + $0x240] sm:$0xff] }
 0x2e1   :  { %v697_v29 = vadd.f32 %v691_v21, %v655_v17  ;;  %1051 = vmatpush.msra.mxu1 %v883_v10  ;;  %v882_v17 = vld [vmem:[%s2275_s9 + $0x88] sm:$0xff]  ;;  %v985_v10 = vld [vmem:[%s2275_s9 + $0x3c0] sm:$0xff] }
 0x2e2   :  { %1031 = vmatpush.msra.mxu0 %v867_v9  ;;  %1091 = vmatpush.msrb.mxu3 %v915_v13  ;;  %v914_v21 = vld [vmem:[%s2275_s9 + $0x188] sm:$0xff]  ;;  %v969_v9 = vld [vmem:[%s2275_s9 + $0x340] sm:$0xff]  ;;  %v952_v13 = vld [vmem:[%s2275_s9 + $0x2b8] sm:$0xff] }
 0x2e3   :  { %1052 = vmatpush.msra.mxu1 %v882_v17  ;;  %v951_v17 = vld [vmem:[%s2275_s9 + $0x2b0] sm:$0xff] }
 0x2e4   :  { %v583_v11 = vpop.f32.mrf.mxu3  ;;  %1032 = vmatpush.msra.mxu0 %v866_v16  ;;  %1092 = vmatpush.msrb.mxu3 %v914_v21  ;;  %v935_v16 = vld [vmem:[%s2275_s9 + $0x230] sm:$0xff]  ;;  %v934_v21 = vld [vmem:[%s2275_s9 + $0x228] sm:$0xff] }
 0x2e5   :  { %v613_v30 = vadd.f32 %v612_v26, %v583_v11  ;;  %1053 = vmatpush.msra.mxu1 %v881_v23  ;;  %v913_v26 = vld [vmem:[%s2275_s9 + $0x180] sm:$0xff]  ;;  %v966_v23 = vld [vmem:[%s2275_s9 + $0x328] sm:$0xff] }
 0x2e6   :  { %1033 = vmatpush.msra.mxu0 %v865_v22  ;;  %1093 = vmatpush.msrb.mxu3 %v913_v26  ;;  %v950_v22 = vld [vmem:[%s2275_s9 + $0x2a8] sm:$0xff]  ;;  %v949_v26 = vld [vmem:[%s2275_s9 + $0x2a0] sm:$0xff] }
 0x2e7   :  { %v656_v42 = vadd.f32 %v652_v40, %v613_v30  ;;  %v694_v50 = vpop.f32.mrf.mxu2  ;;  %v976_v30 = vld [vmem:[%s2275_s9 + $0x378] sm:$0xff]  ;;  %1118 = vmatpush.msrb.mxu1 %v960_v28  ;;  %v958_v40 = vld [vmem:[%s2275_s9 + $0x2e8] sm:$0xff]  ;;  %v981_v28 = vld [vmem:[%s2275_s9 + $0x3a0] sm:$0xff] }
 0x2e8   :  { %1138 = vmatpush.msra.mxu2 %v976_v30  ;;  %1158 = vmatpush.msra.mxu3 %v992_v31  ;;  %v948_v30 = vld [vmem:[%s2275_s9 + $0x298] sm:$0xff] }
 0x2e9   :  { %v698_v53 = vadd.f32 %v694_v50, %v656_v42  ;;  %v940_v50 = vld [vmem:[%s2275_s9 + $0x258] sm:$0xff] }
 0x2ea   :  { %1159 = vmatpush.msra.mxu3 %v991_v37  ;;  %v964_v31 = vld [vmem:[%s2275_s9 + $0x318] sm:$0xff] }
 0x2ec   :  { %v733_v34 = vpop.f32.mrf.mxu3  ;;  %1160 = vmatpush.msra.mxu3 %v990_v44  ;;  %v962_v44 = vld [vmem:[%s2275_s9 + $0x308] sm:$0xff] }
 0x2ed   :  { %v739_v36 = vadd.f32 %v733_v34, %v697_v29  ;;  %v959_v34 = vld [vmem:[%s2275_s9 + $0x2f0] sm:$0xff] }
 0x2ee   :  { %1119 = vmatpush.msrb.mxu1 %v959_v34  ;;  %1161 = vmatpush.msra.mxu3 %v989_v49  ;;  %v947_v34 = vld [vmem:[%s2275_s9 + $0x290] sm:$0xff]  ;;  %v961_v49 = vld [vmem:[%s2275_s9 + $0x300] sm:$0xff] }
 0x2ef   :  { %v1836_v43 = vadd.f32 %v1806_v27, %v739_v36  ;;  %v975_v36 = vld [vmem:[%s2275_s9 + $0x370] sm:$0xff] }
 0x2f0   :  { %1139 = vmatpush.msra.mxu2 %v975_v36  ;;  %1120 = vmatpush.msrb.mxu1 %v958_v40  ;;  %v979_v36 = vld [vmem:[%s2275_s9 + $0x390] sm:$0xff] }
 0x2f1   :  { %773 = vst.sshfl [vmem:[#allocation1] sm:$0xff pattern:$0x73625140] %v1836_v43  ;;  %v764_v0 = vrot.slane %v1836_v43, 1  ;;  %1162 = vmatpush.msra.mxu3 %v988_v54 }
 0x2f2   :  { %1140 = vmatpush.msra.mxu2 %v974_v41  ;;  %1121 = vmatpush.msrb.mxu1 %v957_v46  ;;  %v930_v41 = vld [vmem:[%s2275_s9 + $0x208] sm:$0xff]  ;;  %v929_v46 = vld [vmem:[%s2275_s9 + $0x200] sm:$0xff] }
 0x2f3   :  { %1163 = vmatpush.msra.mxu3 %v987_v61 }
 0x2f4   :  { %v736_v57 = vpop.f32.mrf.mxu3  ;;  %1141 = vmatpush.msra.mxu2 %v973_v48  ;;  %1122 = vmatpush.msrb.mxu1 %v956_v52 }
 0x2f5   :  { %v740_v59 = vadd.f32 %v736_v57, %v698_v53  ;;  %v972_v53 = vld [vmem:[%s2275_s9 + $0x358] sm:$0xff]  ;;  %v939_v57 = vld [vmem:[%s2275_s9 + $0x250] sm:$0xff]  ;;  %1164 = vmatpush.msra.mxu3 %v986_v4 }
 0x2f6   :  { %1142 = vmatpush.msra.mxu2 %v972_v53  ;;  %1123 = vmatpush.msrb.mxu1 %v955_v58 }
 0x2f7   :  { %v1889_v1 = vadd.f32 %v1806_v27, %v740_v59  ;;  %v944_v27 = vld [vmem:[%s2275_s9 + $0x278] sm:$0xff]  ;;  %v971_v59 = vld [vmem:[%s2275_s9 + $0x350] sm:$0xff]  ;;  %1165 = vmatpush.msra.mxu3 %v985_v10 }
 0x2f8   :  { %v1900_v5 = vld [vmem:[#allocation1 + $0x1] ss:$4 sm:$0xff]  ;;  %1098 = vmatpush.msrb.mxu0 %v944_v27  ;;  %1143 = vmatpush.msra.mxu2 %v971_v59 }
 0x2f9   :  { %788 = vst.sshfl [vmem:[#allocation1] sm:$0xff pattern:$0x73625140] %v1836_v43  ;;  %v753_v7 = vrot.slane %v1889_v1, 7  ;;  %v767_v8 = vsel %vm754_vm6, %v1889_v1, %v764_v0  ;;  %v954_v0 = vld [vmem:[%s2275_s9 + $0x2c8] sm:$0xff]  ;;  %v965_v27 = vld [vmem:[%s2275_s9 + $0x320] sm:$0xff] }
 0x2fa   :  { %v768_v11 = vsel %vm756_vm7, %v1889_v1, %v767_v8  ;;  %776 = vst.sshfl [vmem:[#allocation1 + $0x20] sm:$0xff pattern:$0x73625140] %v1889_v1  ;;  %1099 = vmatpush.msrb.mxu0 %v943_v33  ;;  %1124 = vmatpush.msrb.mxu1 %v954_v0  ;;  %v931_v33 = vld [vmem:[%s2275_s9 + $0x210] sm:$0xff] }
 0x2fb   :  { %v755_v14 = vsel %vm754_vm6, %v753_v7, %v1836_v43  ;;  %v769_v15 = vsel %vm758_vm8, %v1889_v1, %v768_v11  ;;  %1144 = vmatpush.msra.mxu2 %v970_v3 }
 0x2fc   :  { %v757_v19 = vsel %vm756_vm7, %v753_v7, %v755_v14  ;;  %v770_v20 = vsel %vm760_vm9, %v1889_v1, %v769_v15  ;;  %1100 = vmatpush.msrb.mxu0 %v942_v39  ;;  %v968_v14 = vld [vmem:[%s2275_s9 + $0x338] sm:$0xff] }
 0x2fd   :  { %772 = vst [vmem:[#allocation3 + $0x2] sm:$0x3] %v770_v20  ;;  %v759_v25 = vsel %vm758_vm8, %v753_v7, %v757_v19  ;;  %v984_v15 = vld [vmem:[%s2275_s9 + $0x3b8] sm:$0xff]  ;;  %1145 = vmatpush.msra.mxu2 %v969_v9  ;;  %v967_v19 = vld [vmem:[%s2275_s9 + $0x330] sm:$0xff] }
 0x2fe   :  { %v761_v29 = vsel %vm760_vm9, %v753_v7, %v759_v25  ;;  %1101 = vmatpush.msrb.mxu0 %v941_v45  ;;  %v953_v7 = vld [vmem:[%s2275_s9 + $0x2c0] sm:$0xff]  ;;  %v983_v20 = vld [vmem:[%s2275_s9 + $0x3b0] sm:$0xff]  ;;  %1166 = vmatpush.msra.mxu3 %v984_v15 }
 0x2ff   :  { %763 = vst [vmem:[#allocation3] sm:$0x3] %v761_v29  ;;  %1125 = vmatpush.msrb.mxu1 %v953_v7  ;;  %1146 = vmatpush.msra.mxu2 %v968_v14  ;;  %v933_v25 = vld [vmem:[%s2275_s9 + $0x220] sm:$0xff]  ;;  %v932_v29 = vld [vmem:[%s2275_s9 + $0x218] sm:$0xff] }
 0x300   :  { %v790_v32 = vld [vmem:[#allocation1 + $0x1] ss:$4 sm:$0xff]  ;;  %1102 = vmatpush.msrb.mxu0 %v940_v50  ;;  %1167 = vmatpush.msra.mxu3 %v983_v20 }
 0x301   :  { %803 = vst.sshfl [vmem:[#allocation1] sm:$0xff pattern:$0x73625140] %v1836_v43  ;;  %v778_v35 = vld [vmem:[#allocation1 + $0x21] ss:$4 sm:$0xff]  ;;  %v794_v55 = vrot.slane %v790_v32, 1  ;;  %1126 = vmatpush.msrb.mxu1 %v952_v13  ;;  %1147 = vmatpush.msra.mxu2 %v967_v19 }
 0x302   :  { %791 = vst.sshfl [vmem:[#allocation1 + $0x20] sm:$0xff pattern:$0x73625140] %v1889_v1  ;;  %v781_v38 = vrot.slane %v778_v35, 7  ;;  %1103 = vmatpush.msrb.mxu0 %v939_v57  ;;  %1168 = vmatpush.msra.mxu3 %v982_v24  ;;  %v980_v32 = vld [vmem:[%s2275_s9 + $0x398] sm:$0xff]  ;;  %v963_v35 = vld [vmem:[%s2275_s9 + $0x310] sm:$0xff] }
 0x303   :  { %1127 = vmatpush.msrb.mxu1 %v951_v17  ;;  %1148 = vmatpush.msra.mxu2 %v966_v23  ;;  %v977_v50 = vld [vmem:[%s2275_s9 + $0x380] sm:$0xff]  ;;  %v1188_v19 = vld [vmem:[%s2277_s11 + $0x50] sm:$0xff]  ;;  %v1187_v20 = vld [vmem:[%s2277_s11 + $0x48] sm:$0xff] }
 0x304   :  { %v782_v42 = vsel %vm754_vm6, %v781_v38, %v1900_v5  ;;  %1104 = vmatpush.msrb.mxu0 %v938_v62  ;;  %1169 = vmatpush.msra.mxu3 %v981_v28  ;;  %v1190_v17 = vld [vmem:[%s2277_s11 + $0x60] sm:$0xf]  ;;  %v1184_v23 = vld [vmem:[%s2277_s11 + $0x30] sm:$0xff]  ;;  %v1183_v24 = vld [vmem:[%s2277_s11 + $0x28] sm:$0xff] }
 0x305   :  { %v783_v47 = vsel %vm756_vm7, %v781_v38, %v782_v42  ;;  %1128 = vmatpush.msrb.mxu1 %v950_v22  ;;  %1149 = vmatpush.msra.mxu2 %v965_v27  ;;  %v946_v42 = vld [vmem:[%s2275_s9 + $0x288] sm:$0xff]  ;;  %v1185_v22 = vld [vmem:[%s2277_s11 + $0x38] sm:$0xff]  ;;  %v1180_v27 = vld [vmem:[%s2277_s11 + $0x10] sm:$0xff] }
 0x306   :  { %v784_v51 = vsel %vm758_vm8, %v781_v38, %v783_v47  ;;  %1105 = vmatpush.msrb.mxu0 %v937_v6  ;;  %1170 = vmatpush.msra.mxu3 %v980_v32  ;;  %v945_v47 = vld [vmem:[%s2275_s9 + $0x280] sm:$0xff]  ;;  %v1179_v28 = vld [vmem:[%s2277_s11 + $0x8] sm:$0xff] }
 0x307   :  { %v785_v56 = vsel %vm760_vm9, %v781_v38, %v784_v51  ;;  %1129 = vmatpush.msrb.mxu1 %v949_v26  ;;  %1150 = vmatpush.msra.mxu2 %v964_v31  ;;  %v1181_v26 = vld [vmem:[%s2277_s11 + $0x18] sm:$0xff]  ;;  %v1229_v31 = vld [vmem:[%s2278_s13 + $0x30] sm:$0xff]  ;;  %v1228_v32 = vld [vmem:[%s2278_s13 + $0x28] sm:$0xff] }
 0x308   :  { %v2033_v60 = vld [vmem:[#allocation1 + $0x2] ss:$4 sm:$0xff]  ;;  %787 = vst [vmem:[#allocation3 + $0x4] sm:$0x3] %v785_v56  ;;  %1106 = vmatpush.msrb.mxu0 %v936_v12  ;;  %1171 = vmatpush.msra.mxu3 %v979_v36 }
 0x309   :  { %818 = vst.sshfl [vmem:[#allocation1] sm:$0xff pattern:$0x73625140] %v1836_v43  ;;  %v793_v63 = vld [vmem:[#allocation1 + $0x21] ss:$4 sm:$0xff]  ;;  %1130 = vmatpush.msrb.mxu1 %v948_v30  ;;  %1151 = vmatpush.msra.mxu2 %v963_v35 }
 0x30a   :  { %v797_v2 = vsel %vm754_vm6, %v793_v63, %v794_v55  ;;  %806 = vst.sshfl [vmem:[#allocation1 + $0x20] sm:$0xff pattern:$0x73625140] %v1889_v1  ;;  %1107 = vmatpush.msrb.mxu0 %v935_v16  ;;  %v1230_v30 = vld [vmem:[%s2278_s13 + $0x38] sm:$0xff] }
 0x30b   :  { %v798_v5 = vsel %vm756_vm7, %v793_v63, %v797_v2  ;;  %1131 = vmatpush.msrb.mxu1 %v947_v34  ;;  %1152 = vmatpush.msra.mxu2 %v962_v44  ;;  %v1372_v34 = vld [vmem:[%s2274_s10] ss:$0 sm:$0xff]  ;;  %v1226_v35 = vld [vmem:[%s2278_s13 + $0x18] sm:$0xff] }
 0x30c   :  { %v799_v8 = vsel %vm758_vm8, %v793_v63, %v798_v5  ;;  %1108 = vmatpush.msrb.mxu0 %v934_v21  ;;  %v1186_v21 = vld [vmem:[%s2277_s11 + $0x40] sm:$0xff] }
 0x30d   :  { %v800_v11 = vsel %vm760_vm9, %v793_v63, %v799_v8  ;;  %1132 = vmatpush.msrb.mxu1 %v946_v42  ;;  %1153 = vmatpush.msra.mxu2 %v961_v49 }
 0x30e   :  { %802 = vst [vmem:[#allocation3 + $0x6] sm:$0x3] %v800_v11  ;;  %1109 = vmatpush.msrb.mxu0 %v933_v25  ;;  %v1182_v25 = vld [vmem:[%s2277_s11 + $0x20] sm:$0xff] }
 0x30f   :  { %1133 = vmatpush.msrb.mxu1 %v945_v47 }
 0x310   :  { %v2086_v18 = vld [vmem:[#allocation1 + $0x2] ss:$4 sm:$0xff]  ;;  %1110 = vmatpush.msrb.mxu0 %v932_v29 }
 0x311   :  { %833 = vst.sshfl [vmem:[#allocation1] sm:$0xff pattern:$0x73625140] %v1836_v43  ;;  %v808_v37 = vld [vmem:[#allocation1 + $0x22] ss:$4 sm:$0xff]  ;;  %v824_v53 = vrot.slane %v2086_v18, 1 }
 0x312   :  { %v811_v39 = vrot.slane %v808_v37, 7  ;;  %821 = vst.sshfl [vmem:[#allocation1 + $0x20] sm:$0xff pattern:$0x73625140] %v1889_v1  ;;  %1111 = vmatpush.msrb.mxu0 %v931_v33  ;;  %v1189_v18 = vld [vmem:[%s2277_s11 + $0x58] sm:$0xff]  ;;  %v1178_v29 = vld [vmem:[%s2277_s11] sm:$0xff] }
 0x313   :  { %v1227_v33 = vld [vmem:[%s2278_s13 + $0x20] sm:$0xff]  ;;  %v1225_v37 = vld [vmem:[%s2278_s13 + $0x10] sm:$0xff] }
 0x314   :  { %v812_v45 = vsel %vm754_vm6, %v811_v39, %v2033_v60  ;;  %1112 = vmatpush.msrb.mxu0 %v930_v41 }
 0x315   :  { %v863_v40 = vld [vmem:[#allocation3] sm:$0xff]  ;;  %v813_v48 = vsel %vm756_vm7, %v811_v39, %v812_v45 }
 0x316   :  { %v814_v51 = vsel %vm758_vm8, %v811_v39, %v813_v48  ;;  %1113 = vmatpush.msrb.mxu0 %v929_v46 }
 0x317   :  { %v815_v52 = vsel %vm760_vm9, %v811_v39, %v814_v51 }
 0x318   :  { %v835_v38 = vld [vmem:[#allocation1 + $0x3] ss:$4 sm:$0xff]  ;;  %817 = vst [vmem:[#allocation3 + $0x8] sm:$0x3] %v815_v52 }
 0x319   :  { %848 = vst.sshfl [vmem:[#allocation1] sm:$0xff pattern:$0x73625140] %v1836_v43  ;;  %v978_v43 = vld [vmem:[%s2275_s9 + $0x388] sm:$0xff] }
 0x31a   :  { %999 = vst [vmem:[#allocation1] ss:$4 sm:$0xff] %v863_v40  ;;  %1172 = vmatpush.msra.mxu3 %v978_v43  ;;  %v823_v54 = vld [vmem:[#allocation1 + $0x22] ss:$4 sm:$0xff] }
 0x31b   :  { %v827_v55 = vsel %vm754_vm6, %v823_v54, %v824_v53  ;;  %836 = vst.sshfl [vmem:[#allocation1 + $0x20] sm:$0xff pattern:$0x73625140] %v1889_v1  ;;  %v1224_v53 = vld [vmem:[%s2278_s13 + $0x8] sm:$0xff] }
 0x31c   :  { %1173 = vmatpush.msra.mxu3 %v977_v50  ;;  %v828_v57 = vsel %vm756_vm7, %v823_v54, %v827_v55  ;;  %v20_v55 = vstv %s2279_s14 }
 0x31d   :  { %v829_v60 = vsel %vm758_vm8, %v823_v54, %v828_v57  ;;  %21 = vst [vmem:[#allocation4] sm:$0x1] %v20_v55 }
 0x31e   :  { %v830_v62 = vsel %vm760_vm9, %v823_v54, %v829_v60  ;;  %v1223_v54 = vld [vmem:[%s2278_s13] sm:$0xff] }
 0x31f   :  { %832 = vst [vmem:[#allocation3 + $0xa] sm:$0x3] %v830_v62 }
 0x320   :  { %v850_v3 = vld [vmem:[#allocation1 + $0x3] ss:$4 sm:$0xff] }
 0x321   :  { %v1002_v56 = vld.sshfl [vmem:[#allocation1] sm:$0xff pattern:$0x73625140]  ;;  %v1003_v58 = vld.sshfl [vmem:[#allocation1 + $0x8] sm:$0xff pattern:$0x73625140] }
 0x322   :  { %1034 = vmatmul.f32.vlgmr.msra.gmra.mxu0 %v1002_v56  ;;  %v1004_v59 = vld.sshfl [vmem:[#allocation1 + $0x10] sm:$0xff pattern:$0x73625140]  ;;  %1054 = vmatmul.f32.vlgmr.msra.gmra.mxu1 %v1003_v58  ;;  %v1005_v61 = vld.sshfl [vmem:[#allocation1 + $0x18] sm:$0xff pattern:$0x73625140] }
 0x323   :  { %1074 = vmatmul.f32.vlgmr.msrb.gmra.mxu2 %v1004_v59  ;;  %1094 = vmatmul.f32.vlgmr.msrb.gmra.mxu3 %v1005_v61  ;;  %v838_v63 = vld [vmem:[#allocation1 + $0x23] ss:$4 sm:$0xff]  ;;  %v854_v7 = vrot.slane %v850_v3, 1  ;;  %v1373_v56 = vld [vmem:[%s2276_s12] ss:$0 sm:$0xff] }
 0x324   :  { %v841_v0 = vrot.slane %v838_v63, 7  ;;  %851 = vst.sshfl [vmem:[#allocation1 + $0x20] sm:$0xff pattern:$0x73625140] %v1889_v1  ;;  %1351 = vmatpush.msk.msra.mxu0 %vm1199_vm10, %v1190_v17  ;;  %1246 = vmatpush.msra.mxu1 %v1230_v30  ;;  %v1374_v59 = vld [vmem:[#allocation4] ss:$0 sm:$0xff] }
 0x326   :  { %v842_v2 = vsel %vm754_vm6, %v841_v0, %v835_v38  ;;  %1207 = vmatpush.msra.mxu0 %v1189_v18  ;;  %1247 = vmatpush.msra.mxu1 %v1229_v31 }
 0x327   :  { %v843_v4 = vsel %vm756_vm7, %v841_v0, %v842_v2 }
 0x328   :  { %v844_v5 = vsel %vm758_vm8, %v841_v0, %v843_v4  ;;  %1208 = vmatpush.msra.mxu0 %v1188_v19  ;;  %1248 = vmatpush.msra.mxu1 %v1228_v32 }
 0x329   :  { %v845_v6 = vsel %vm760_vm9, %v841_v0, %v844_v5 }
 0x32a   :  { %847 = vst [vmem:[#allocation3 + $0xc] sm:$0x3] %v845_v6  ;;  %1209 = vmatpush.msra.mxu0 %v1187_v20  ;;  %1249 = vmatpush.msra.mxu1 %v1227_v33 }
 0x32b   :  { %v853_v8 = vld [vmem:[#allocation1 + $0x23] ss:$4 sm:$0xff] }
 0x32c   :  { %v857_v9 = vsel %vm754_vm6, %v853_v8, %v854_v7  ;;  %1210 = vmatpush.msra.mxu0 %v1186_v21  ;;  %1250 = vmatpush.msra.mxu1 %v1226_v35 }
 0x32d   :  { %v858_v10 = vsel %vm756_vm7, %v853_v8, %v857_v9 }
 0x32e   :  { %v859_v11 = vsel %vm758_vm8, %v853_v8, %v858_v10  ;;  %1211 = vmatpush.msra.mxu0 %v1185_v22  ;;  %1251 = vmatpush.msra.mxu1 %v1225_v37 }
 0x32f   :  { %v860_v1 = vsel %vm760_vm9, %v853_v8, %v859_v11 }
 0x330   :  { %862 = vst [vmem:[#allocation3 + $0xe] sm:$0x3] %v860_v1  ;;  %1212 = vmatpush.msra.mxu0 %v1184_v23  ;;  %1252 = vmatpush.msra.mxu1 %v1224_v53 }
 0x332   :  { %1213 = vmatpush.msra.mxu0 %v1183_v24  ;;  %1253 = vmatpush.msra.mxu1 %v1223_v54 }
 0x334   :  { %1214 = vmatpush.msra.mxu0 %v1182_v25 }
 0x336   :  { %1215 = vmatpush.msra.mxu0 %v1181_v26 }
 0x337   :  { %v864_v12 = vld [vmem:[#allocation3 + $0x8] sm:$0xff] }
 0x338   :  { %1001 = vst [vmem:[#allocation1 + $0x20] ss:$4 sm:$0xff] %v864_v12  ;;  %1216 = vmatpush.msra.mxu0 %v1180_v27 }
 0x33a   :  { %1217 = vmatpush.msra.mxu0 %v1179_v28 }
 0x33c   :  { %1218 = vmatpush.msra.mxu0 %v1178_v29 }
 0x33f   :  { %v1006_v13 = vld.sshfl [vmem:[#allocation1 + $0x20] sm:$0xff pattern:$0x73625140]  ;;  %v1007_v14 = vld.sshfl [vmem:[#allocation1 + $0x28] sm:$0xff pattern:$0x73625140] }
 0x340   :  { %1114 = vmatmul.f32.vlgmr.msrb.gmra.mxu0 %v1006_v13  ;;  %1134 = vmatmul.f32.vlgmr.msrb.gmra.mxu1 %v1007_v14  ;;  %v1008_v15 = vld.sshfl [vmem:[#allocation1 + $0x30] sm:$0xff pattern:$0x73625140]  ;;  %v1009_v16 = vld.sshfl [vmem:[#allocation1 + $0x38] sm:$0xff pattern:$0x73625140] }
 0x341   :  { %1154 = vmatmul.f32.vlgmr.msra.gmra.mxu2 %v1008_v15  ;;  %1174 = vmatmul.f32.vlgmr.msra.gmra.mxu3 %v1009_v16 }
 0x39f   :  { %v1035_v36 = vpop.f32.mrf.mxu0  ;;  %v1055_v39 = vpop.f32.mrf.mxu1 }
 0x3a0   :  { %v1036_v38 = vadd.f32 %v1372_v34, %v1035_v36 }
 0x3a2   :  { %v1056_v41 = vadd.f32 %v1055_v39, %v1036_v38 }
 0x3a6   :  { %v1075_v40 = vpop.f32.mrf.mxu2  ;;  %v1095_v44 = vpop.f32.mrf.mxu3 }
 0x3a7   :  { %v1076_v42 = vadd.f32 %v1075_v40, %v1056_v41 }
 0x3a9   :  { %v1096_v43 = vadd.f32 %v1095_v44, %v1076_v42 }
 0x3bd   :  { %v1115_v45 = vpop.f32.mrf.mxu0  ;;  %v1135_v47 = vpop.f32.mrf.mxu1 }
 0x3be   :  { %v1116_v46 = vadd.f32 %v1115_v45, %v1096_v43 }
 0x3c0   :  { %v1136_v48 = vadd.f32 %v1135_v47, %v1116_v46 }
 0x3c4   :  { %v1155_v49 = vpop.f32.mrf.mxu2  ;;  %v1175_v51 = vpop.f32.mrf.mxu3 }
 0x3c5   :  { %v1156_v50 = vadd.f32 %v1155_v49, %v1136_v48 }
 0x3c7   :  { %v1176_v52 = vadd.f32 %v1175_v51, %v1156_v50 }
 0x3c9   :  { %1352 = vmatmul.msk.f32.vlgmr.msra.gmra.mxu0 %vm1195_vm11, %v1176_v52 }
 0x446   :  { %v1220_v57 = vpop.f32.mrf.mxu0 }
 0x447   :  { %v1221_v58 = vadd.f32 %v1373_v56, %v1220_v57 }
 0x449   :  { %1353 = vmatmul.msk.f32.vlgmr.msra.gmra.mxu1 %vm533_vm5, %v1221_v58 }
 0x4c6   :  { %v1255_v60 = vpop.f32.mrf.mxu1 }
 0x4c7   :  { %v1256_v61 = vadd.f32 %v1374_v59, %v1255_v60 }
 0x4c9   :  { %1259 = vst.msk [vmem:[%s2280_s15] sm:$0x3] %vm1258_vm12, %v1256_v61 }

</bundles_post_ra>
